<compile_context>
chip_gen: v7x
topology: tpu7x:2x2x1
jax: 0.10.0
libtpu: 0.0.40
codegen_flags: <defaults>
</compile_context>

<pallas_src>
import jax
import jax.numpy as jnp
from jax.experimental import pallas as pl
from jax.experimental.pallas import tpu as pltpu


def _sigmoid_via_tanh(x):
    # Exact identity; tanh lowers to the EUP slot instead of a VALU divide chain.
    return 0.5 * (jnp.tanh(0.5 * x) + 1.0)


# ----------------------------------------------------------------------------
# Wrapper-side preparation (shared by the forward pass and the test reference).
# ----------------------------------------------------------------------------
def _prepare_inputs(x_time, params, matmul_dtype=jnp.bfloat16):
    B, T, M, D = x_time.shape
    I, H = M * D, D
    Bp = ((B + 7) // 8) * 8                      # pad batch to 8 sublanes

    x_flat = x_time.reshape(B, T, I)
    if Bp != B:
        # Pad BEFORE the projection so the (tiny) extra rows are absorbed by the
        # einsum instead of requiring a separate full-gi padding pass.
        x_flat = jnp.pad(x_flat, ((0, Bp - B), (0, 0), (0, 0)))

    # Gate-major layouts; PyTorch gate order (r, z, n) preserved.
    w_ih_gih = jnp.swapaxes(params["w_ih"].reshape(3, H, I), 1, 2)    # (3, I, H)
    w_hh_ghh = jnp.swapaxes(params["w_hh"].reshape(3, H, H), 1, 2)    # (3, H, H): gh_g = h @ w_hh_ghh[g]
    b_ih_g = params["b_ih"].reshape(3, H).astype(jnp.float32)
    b_hh_g = params["b_hh"].reshape(3, H).astype(jnp.float32)

    # Fold b_hh[r], b_hh[z] into the gi bias (they commute through the sigmoid sum);
    # b_hh[n] must stay inside r * (h@W_n + b_n).
    gi_bias = b_ih_g + jnp.concatenate(
        [b_hh_g[:2], jnp.zeros((1, H), jnp.float32)], axis=0)          # (3, H)

    # Hoisted input projection: one full-occupancy MXU matmul over all T*B rows,
    # gate-major / time-major output.  Stored bf16 in HBM (dominant pipelined
    # stream of the recurrence).  NOTE: if the HLO shows a standalone transpose
    # after the dot for 'tgbh', consider the dot-natural (B,T,3,H) layout instead.
    gi = (jnp.einsum("bti,gih->tgbh",
                     x_flat.astype(matmul_dtype),
                     w_ih_gih.astype(matmul_dtype),
                     preferred_element_type=jnp.float32)
          + gi_bias[None, :, None, :]).astype(matmul_dtype)           # (T, 3, Bp, H)

    h0 = jnp.broadcast_to(params["hidden"][0], (Bp, H)).astype(jnp.float32)
    b_hh_n = b_hh_g[2].reshape(1, H)

    fused = (H % 128 == 0)
    if fused:
        # One (B,H)@(H,3H) dot per step; gate columns land 128-lane aligned.
        w_hh_arg = jnp.concatenate(
            [w_hh_ghh[0], w_hh_ghh[1], w_hh_ghh[2]], axis=1).astype(matmul_dtype)   # (H, 3H)
    else:
        w_hh_arg = w_hh_ghh.astype(matmul_dtype)                       # (3, H, H)

    return gi, h0, w_hh_arg, b_hh_n, w_hh_ghh, fused, B, Bp


# ----------------------------------------------------------------------------
# Pallas kernel: sequential GRU recurrence over precomputed input gates.
# ----------------------------------------------------------------------------
def gru_recurrence_pallas(gi, h0, w_hh, b_hh_n, *, fused,
                          tblk_cap=8, vmem_limit_bytes=48 * 1024 * 1024):
    """gi: (T, 3, Bp, H) bf16; h0: (Bp, H) f32; w_hh: (H,3H) or (3,H,H) bf16;
    b_hh_n: (1, H) f32.  Returns (Bp, T, H) f32 hidden states."""
    T, G, Bp, H = gi.shape
    assert G == 3 and Bp % 8 == 0

    # --- TBLK from the actual resident VMEM footprint (review item 1/3). -----
    Hp = ((H + 127) // 128) * 128                       # lane padding
    gi_rows = ((Bp + 15) // 16) * 16                    # bf16 sublane tile = 16
    bytes_per_step = (2 * (3 * gi_rows * Hp * 2)        # 2x double-buffered gi (bf16)
                      + 2 * (Bp * Hp * 4))              # 2x out block (f32)
    fixed_bytes = 3 * H * Hp * 2 + Bp * Hp * 4 + Hp * 4 # W_hh + carry + b_n
    budget = int(0.75 * vmem_limit_bytes) - fixed_bytes # 25% headroom for Mosaic
    max_steps_by_vmem = max(1, budget // bytes_per_step) if budget > bytes_per_step else 1
    cap = max(1, min(tblk_cap, max_steps_by_vmem))      # also bounds unroll/vreg pressure

    def _pick(pred):
        best = 0
        for d in range(1, min(T, cap) + 1):
            if T % d == 0 and pred(d):
                best = d
        return best

    tblk = 0
    if fused:
        # Direct (Bp, T, H) output needs the block's second-minor dim (tblk) to be
        # a multiple of 8 or equal to T.
        tblk = _pick(lambda d: d % 8 == 0 or d == T)
    wide_out = fused and tblk > 0
    if tblk == 0:
        tblk = _pick(lambda d: True)
    n_blk = T // tblk

    if wide_out:
        out_shape = jax.ShapeDtypeStruct((Bp, T, H), jnp.float32)
        out_spec = pl.BlockSpec((Bp, tblk, H), lambda tb: (0, tb, 0))
    else:
        # Lane-dense slab for H < 128: unmasked HBM writeback (tblk*H >= 128 when possible).
        out_shape = jax.ShapeDtypeStruct((n_blk, Bp, tblk * H), jnp.float32)
        out_spec = pl.BlockSpec((1, Bp, tblk * H), lambda tb: (tb, 0, 0))

    def kernel(gi_ref, h0_hbm, whh_hbm, bn_hbm, out_ref,
               h_carry, whh_vmem, bn_vmem, sems):
        @pl.when(pl.program_id(0) == 0)
        def _():
            # One-time preload of the recurrent weights / bias / initial state.
            # (Grid axis is 'arbitrary' => sequential, so scratch persists safely.)
            cw = pltpu.make_async_copy(whh_hbm, whh_vmem, sems.at[0])
            cb = pltpu.make_async_copy(bn_hbm, bn_vmem, sems.at[1])
            ch = pltpu.make_async_copy(h0_hbm, h_carry, sems.at[2])
            cw.start(); cb.start(); ch.start()
            ch.wait(); cb.wait(); cw.wait()

        h = h_carry[...]                                      # (Bp, H) f32 carry
        # Hoisted: one broadcast per block (JAX does not CSE broadcast_in_dim per step).
        b_n = jnp.broadcast_to(bn_vmem[...], (Bp, H))
        if fused:
            w_all = whh_vmem[...]                             # (H, 3H) bf16
        else:
            w_r, w_z, w_n = whh_vmem[0], whh_vmem[1], whh_vmem[2]

        # Static unroll over the time block; tblk is capped (<= tblk_cap) so the
        # unrolled live ranges stay within the vreg budget.
        for s in range(tblk):
            hb = h.astype(whh_vmem.dtype)                     # bf16 only for the matmul
            if fused:
                gh = jnp.dot(hb, w_all, preferred_element_type=jnp.float32)   # (Bp, 3H)
                gh_r, gh_z, gh_n = gh[:, :H], gh[:, H:2 * H], gh[:, 2 * H:]
            else:
                gh_r = jnp.dot(hb, w_r, preferred_element_type=jnp.float32)
                gh_z = jnp.dot(hb, w_z, preferred_element_type=jnp.float32)
                gh_n = jnp.dot(hb, w_n, preferred_element_type=jnp.float32)
            # b_hh[r], b_hh[z] already folded into gi in the wrapper.
            r = _sigmoid_via_tanh(gi_ref[s, 0].astype(jnp.float32) + gh_r)
            z = _sigmoid_via_tanh(gi_ref[s, 1].astype(jnp.float32) + gh_z)
            n = jnp.tanh(gi_ref[s, 2].astype(jnp.float32) + r * (gh_n + b_n))
            h = n + z * (h - n)
            if wide_out:
                out_ref[:, s, :] = h.astype(out_ref.dtype)
            else:
                out_ref[0, :, s * H:(s + 1) * H] = h.astype(out_ref.dtype)

        h_carry[...] = h

    grid_spec = pltpu.PrefetchScalarGridSpec(
        num_scalar_prefetch=0,
        grid=(n_blk,),
        in_specs=[
            # Pipelined bf16 gate blocks: next block's DMA overlaps this block's compute.
            pl.BlockSpec((tblk, 3, Bp, H), lambda tb: (tb, 0, 0, 0)),
            # Constant operands: raw HBM refs, preloaded once into scratch.
            pl.BlockSpec(memory_space=pl.ANY),    # h0
            pl.BlockSpec(memory_space=pl.ANY),    # W_hh
            pl.BlockSpec(memory_space=pl.ANY),    # b_hh[n]
        ],
        out_specs=out_spec,
        scratch_shapes=[
            pltpu.VMEM((Bp, H), jnp.float32),     # hidden-state carry
            pltpu.VMEM(w_hh.shape, w_hh.dtype),   # resident recurrent weights
            pltpu.VMEM((1, H), jnp.float32),      # resident b_hh[n]
            pltpu.SemaphoreType.DMA((3,)),
        ],
    )
    out = pl.pallas_call(
        kernel,
        out_shape=out_shape,
        grid_spec=grid_spec,
        compiler_params=pltpu.CompilerParams(
            # The carry lives in scratch across grid steps: this axis MUST stay
            # sequential ('arbitrary'); never mark it 'parallel'.
            dimension_semantics=("arbitrary",),
            vmem_limit_bytes=vmem_limit_bytes),
    )(gi, h0, w_hh, b_hh_n)

    if wide_out:
        return out                                            # (Bp, T, H), no extra pass
    # H < 128 fallback: unpack the lane-dense slab (small tensors only).
    return (out.reshape(n_blk, Bp, tblk, H)
               .transpose(1, 0, 2, 3).reshape(Bp, T, H))


# ----------------------------------------------------------------------------
# Forward pass matching the PyTorch module.
# ----------------------------------------------------------------------------
def centralized_stack_forward(x_time, params, *, matmul_dtype=jnp.bfloat16,
                              tblk_cap=8, vmem_limit_bytes=48 * 1024 * 1024):
    """x_time: (B, T, M, D) f32 -> (B, T, M, D)."""
    B, T, M, D = x_time.shape
    gi, h0, w_hh_arg, b_hh_n, _, fused, _, _ = _prepare_inputs(
        x_time, params, matmul_dtype)
    out_bth = gru_recurrence_pallas(
        gi, h0, w_hh_arg, b_hh_n, fused=fused,
        tblk_cap=tblk_cap, vmem_limit_bytes=vmem_limit_bytes)[:B]     # (B, T, H)
    # out.unsqueeze(2).expand(B, T, M, D)
    return jnp.broadcast_to(out_bth[:, :, None, :], (B, T, M, D))


# ----------------------------------------------------------------------------
# References for testing.
# ----------------------------------------------------------------------------
def _gru_recurrence_ref(gi_tgbh, h0, w_hh_ghh, b_hh_n, matmul_dtype=jnp.bfloat16):
    """Precision-mirrored recurrence on the SAME precomputed bf16 gi the kernel sees."""
    w = w_hh_ghh.astype(matmul_dtype)

    def step(h, gi_t):                               # gi_t: (3, Bp, H) bf16
        hb = h.astype(matmul_dtype)
        gh_r = jnp.dot(hb, w[0], preferred_element_type=jnp.float32)
        gh_z = jnp.dot(hb, w[1], preferred_element_type=jnp.float32)
        gh_n = jnp.dot(hb, w[2], preferred_element_type=jnp.float32)
        r = _sigmoid_via_tanh(gi_t[0].astype(jnp.float32) + gh_r)
        z = _sigmoid_via_tanh(gi_t[1].astype(jnp.float32) + gh_z)
        n = jnp.tanh(gi_t[2].astype(jnp.float32) + r * (gh_n + b_hh_n))
        h_new = n + z * (h - n)
        return h_new, h_new

    _, hs = jax.lax.scan(step, h0, gi_tgbh)          # (T, Bp, H)
    return jnp.swapaxes(hs, 0, 1)                    # (Bp, T, H)


def _gru_reference_f32(x_bti, h0, w_ih, w_hh, b_ih, b_hh):
    """Plain full-f32 GRU (PyTorch semantics) for a loose end-to-end sanity check."""
    H = h0.shape[-1]

    def step(h, x_t):
        gi = x_t @ w_ih.T + b_ih
        gh = h @ w_hh.T + b_hh
        r = jax.nn.sigmoid(gi[:, :H] + gh[:, :H])
        z = jax.nn.sigmoid(gi[:, H:2 * H] + gh[:, H:2 * H])
        n = jnp.tanh(gi[:, 2 * H:] + r * gh[:, 2 * H:])
        h_new = (1.0 - z) * n + z * h
        return h_new, h_new

    _, outs = jax.lax.scan(step, h0, jnp.swapaxes(x_bti, 0, 1))
    return jnp.swapaxes(outs, 0, 1)                  # (B, T, H)


if __name__ == "__main__":
    configs = [
        # (B, T, M, D): small-H path (3 per-gate dots + lane-packed slab output)
        dict(B=2, T=8, M=4, D=32),
        # H % 128 == 0 path (fused (H,3H) dot + direct (B,T,H) output)
        dict(B=2, T=8, M=2, D=128),
    ]

    key = jax.random.PRNGKey(0)
    fwd = jax.jit(centralized_stack_forward)

    for cfg in configs:
        B, T, M, D = cfg["B"], cfg["T"], cfg["M"], cfg["D"]
        I, H = M * D, D

        key, k_x, k_wi, k_wh, k_bi, k_bh, k_h0 = jax.random.split(key, 7)
        scale = 1.0 / jnp.sqrt(H)
        params = {
            "w_ih": (jax.random.uniform(k_wi, (3 * H, I), jnp.float32) * 2 - 1) * scale,
            "w_hh": (jax.random.uniform(k_wh, (3 * H, H), jnp.float32) * 2 - 1) * scale,
            "b_ih": (jax.random.uniform(k_bi, (3 * H,), jnp.float32) * 2 - 1) * scale,
            "b_hh": (jax.random.uniform(k_bh, (3 * H,), jnp.float32) * 2 - 1) * scale,
            "hidden": jax.random.normal(k_h0, (1, 1, D), jnp.float32) * 0.1,
        }
        x_time = jax.random.normal(k_x, (B, T, M, D), jnp.float32)

        out = jax.block_until_ready(fwd(x_time, params))
        assert out.shape == (B, T, M, D)
        # GRU output is broadcast (constant) across the M axis, as in the PyTorch expand.
        assert bool(jnp.array_equal(out[:, :, 0, :], out[:, :, 1, :]))

        # Precision-mirrored check: same bf16 gi / bf16 matmul operands / f32 gate math.
        gi, h0p, _, b_hh_n, w_hh_ghh, _, _, _ = _prepare_inputs(x_time, params)
        ref_rec = _gru_recurrence_ref(gi, h0p, w_hh_ghh, b_hh_n)[:B]          # (B, T, H)
        ref_mirror = jnp.broadcast_to(ref_rec[:, :, None, :], (B, T, M, D))
        assert jnp.allclose(out, ref_mirror, atol=1e-2, rtol=1e-2), \
            f"mismatch vs precision-mirrored reference (cfg={cfg})"

        # Loose sanity check vs a full-f32 reference (difference = bf16 operand/gi rounding).
        x_bti = x_time.reshape(B, T, I)
        h0 = jnp.broadcast_to(params["hidden"][0], (B, H)).astype(jnp.float32)
        ref_f32 = _gru_reference_f32(x_bti, h0, params["w_ih"], params["w_hh"],
                                     params["b_ih"], params["b_hh"])
        ref_f32 = jnp.broadcast_to(ref_f32[:, :, None, :], (B, T, M, D))
        assert jnp.allclose(out, ref_f32, atol=1e-1, rtol=1e-1), \
            f"mismatch vs f32 reference (cfg={cfg})"

    print("KERNEL_OK")
</pallas_src>

<mosaic_0001>
module attributes {stable_mosaic.version = 11 : i64} {
  func.func @kernel(%arg0: i32, %arg1: memref<8x3x8x32xbf16, #tpu.memory_space<vmem>>, %arg2: memref<8x32xf32, #tpu.memory_space<any>>, %arg3: memref<3x32x32xbf16, #tpu.memory_space<any>>, %arg4: memref<1x32xf32, #tpu.memory_space<any>>, %arg5: memref<1x8x256xf32, #tpu.memory_space<vmem>>, %arg6: memref<8x32xf32, #tpu.memory_space<vmem>>, %arg7: memref<3x32x32xbf16, #tpu.memory_space<vmem>>, %arg8: memref<1x32xf32, #tpu.memory_space<vmem>>, %arg9: memref<3x!tpu.dma_semaphore, #tpu.memory_space<semaphore_mem>>) attributes {dimension_semantics = [#tpu.dimension_semantics<arbitrary>], iteration_bounds = array<i64: 1>, scalar_prefetch = 0 : i64, scratch_operands = 4 : i64, tpu.core_type = #tpu.core_type<tc>, window_params = [{transform_indices = @transform_0, window_bounds = array<i64: 8, 3, 8, 32>}, {}, {}, {}, {transform_indices = @transform_4, window_bounds = array<i64: 1, 8, 256>}]} {
    %c0_i32 = arith.constant 0 : i32
    %0 = arith.cmpi eq, %arg0, %c0_i32 : i32
    %1 = arith.extui %0 : i1 to i32
    %c0_i32_0 = arith.constant 0 : i32
    %2 = arith.cmpi ne, %1, %c0_i32_0 : i32
    scf.if %2 {
      %c0_i32_192 = arith.constant 0 : i32
      %326 = tpu.memref_slice %arg9[%c0_i32_192] : memref<3x!tpu.dma_semaphore, #tpu.memory_space<semaphore_mem>> -> memref<1x!tpu.dma_semaphore, #tpu.memory_space<semaphore_mem>>
      %327 = tpu.memref_squeeze %326 : memref<1x!tpu.dma_semaphore, #tpu.memory_space<semaphore_mem>> -> memref<!tpu.dma_semaphore, #tpu.memory_space<semaphore_mem>>
      tpu.enqueue_dma source(%arg3 : memref<3x32x32xbf16, #tpu.memory_space<any>>) target(%arg7 : memref<3x32x32xbf16, #tpu.memory_space<vmem>>) target_semaphore(%327 : memref<!tpu.dma_semaphore, #tpu.memory_space<semaphore_mem>>)
      %c1_i32 = arith.constant 1 : i32
      %328 = tpu.memref_slice %arg9[%c1_i32] : memref<3x!tpu.dma_semaphore, #tpu.memory_space<semaphore_mem>> -> memref<1x!tpu.dma_semaphore, #tpu.memory_space<semaphore_mem>>
      %329 = tpu.memref_squeeze %328 : memref<1x!tpu.dma_semaphore, #tpu.memory_space<semaphore_mem>> -> memref<!tpu.dma_semaphore, #tpu.memory_space<semaphore_mem>>
      tpu.enqueue_dma source(%arg4 : memref<1x32xf32, #tpu.memory_space<any>>) target(%arg8 : memref<1x32xf32, #tpu.memory_space<vmem>>) target_semaphore(%329 : memref<!tpu.dma_semaphore, #tpu.memory_space<semaphore_mem>>)
      %c2_i32 = arith.constant 2 : i32
      %330 = tpu.memref_slice %arg9[%c2_i32] : memref<3x!tpu.dma_semaphore, #tpu.memory_space<semaphore_mem>> -> memref<1x!tpu.dma_semaphore, #tpu.memory_space<semaphore_mem>>
      %331 = tpu.memref_squeeze %330 : memref<1x!tpu.dma_semaphore, #tpu.memory_space<semaphore_mem>> -> memref<!tpu.dma_semaphore, #tpu.memory_space<semaphore_mem>>
      tpu.enqueue_dma source(%arg2 : memref<8x32xf32, #tpu.memory_space<any>>) target(%arg6 : memref<8x32xf32, #tpu.memory_space<vmem>>) target_semaphore(%331 : memref<!tpu.dma_semaphore, #tpu.memory_space<semaphore_mem>>)
      %c2_i32_193 = arith.constant 2 : i32
      %332 = tpu.memref_slice %arg9[%c2_i32_193] : memref<3x!tpu.dma_semaphore, #tpu.memory_space<semaphore_mem>> -> memref<1x!tpu.dma_semaphore, #tpu.memory_space<semaphore_mem>>
      %333 = tpu.memref_squeeze %332 : memref<1x!tpu.dma_semaphore, #tpu.memory_space<semaphore_mem>> -> memref<!tpu.dma_semaphore, #tpu.memory_space<semaphore_mem>>
      tpu.wait_dma2 semaphore(%333 : memref<!tpu.dma_semaphore, #tpu.memory_space<semaphore_mem>>) src(%arg2 : memref<8x32xf32, #tpu.memory_space<any>>) dst(%arg6 : memref<8x32xf32, #tpu.memory_space<vmem>>)
      %c1_i32_194 = arith.constant 1 : i32
      %334 = tpu.memref_slice %arg9[%c1_i32_194] : memref<3x!tpu.dma_semaphore, #tpu.memory_space<semaphore_mem>> -> memref<1x!tpu.dma_semaphore, #tpu.memory_space<semaphore_mem>>
      %335 = tpu.memref_squeeze %334 : memref<1x!tpu.dma_semaphore, #tpu.memory_space<semaphore_mem>> -> memref<!tpu.dma_semaphore, #tpu.memory_space<semaphore_mem>>
      tpu.wait_dma2 semaphore(%335 : memref<!tpu.dma_semaphore, #tpu.memory_space<semaphore_mem>>) src(%arg4 : memref<1x32xf32, #tpu.memory_space<any>>) dst(%arg8 : memref<1x32xf32, #tpu.memory_space<vmem>>)
      %c0_i32_195 = arith.constant 0 : i32
      %336 = tpu.memref_slice %arg9[%c0_i32_195] : memref<3x!tpu.dma_semaphore, #tpu.memory_space<semaphore_mem>> -> memref<1x!tpu.dma_semaphore, #tpu.memory_space<semaphore_mem>>
      %337 = tpu.memref_squeeze %336 : memref<1x!tpu.dma_semaphore, #tpu.memory_space<semaphore_mem>> -> memref<!tpu.dma_semaphore, #tpu.memory_space<semaphore_mem>>
      tpu.wait_dma2 semaphore(%337 : memref<!tpu.dma_semaphore, #tpu.memory_space<semaphore_mem>>) src(%arg3 : memref<3x32x32xbf16, #tpu.memory_space<any>>) dst(%arg7 : memref<3x32x32xbf16, #tpu.memory_space<vmem>>)
    } else {
    }
    %c0 = arith.constant 0 : index
    %c0_1 = arith.constant 0 : index
    %3 = vector.load %arg6[%c0, %c0_1] : memref<8x32xf32, #tpu.memory_space<vmem>>, vector<8x32xf32>
    %c0_2 = arith.constant 0 : index
    %c0_3 = arith.constant 0 : index
    %4 = vector.load %arg8[%c0_2, %c0_3] : memref<1x32xf32, #tpu.memory_space<vmem>>, vector<1x32xf32>
    %5 = vector.shape_cast %4 : vector<1x32xf32> to vector<1x32xf32>
    %6 = vector.broadcast %5 : vector<1x32xf32> to vector<8x32xf32>
    %c0_4 = arith.constant 0 : index
    %c0_5 = arith.constant 0 : index
    %c0_6 = arith.constant 0 : index
    %7 = vector.load %arg7[%c0_4, %c0_5, %c0_6] : memref<3x32x32xbf16, #tpu.memory_space<vmem>>, vector<1x32x32xbf16>
    %8 = vector.shape_cast %7 : vector<1x32x32xbf16> to vector<32x32xbf16>
    %c1 = arith.constant 1 : index
    %c0_7 = arith.constant 0 : index
    %c0_8 = arith.constant 0 : index
    %9 = vector.load %arg7[%c1, %c0_7, %c0_8] : memref<3x32x32xbf16, #tpu.memory_space<vmem>>, vector<1x32x32xbf16>
    %10 = vector.shape_cast %9 : vector<1x32x32xbf16> to vector<32x32xbf16>
    %c2 = arith.constant 2 : index
    %c0_9 = arith.constant 0 : index
    %c0_10 = arith.constant 0 : index
    %11 = vector.load %arg7[%c2, %c0_9, %c0_10] : memref<3x32x32xbf16, #tpu.memory_space<vmem>>, vector<1x32x32xbf16>
    %12 = vector.shape_cast %11 : vector<1x32x32xbf16> to vector<32x32xbf16>
    %13 = arith.truncf %3 : vector<8x32xf32> to vector<8x32xbf16>
    %cst = arith.constant dense<0.000000e+00> : vector<8x32xf32>
    %14 = tpu.matmul %13, %8, %cst {dimension_numbers = #tpu.dot_dimension_numbers<[1], [0], [0], [1], [0, 0, 1, 1], [], []>} : vector<8x32xbf16>, vector<32x32xbf16>, vector<8x32xf32> -> vector<8x32xf32>
    %cst_11 = arith.constant dense<0.000000e+00> : vector<8x32xf32>
    %15 = tpu.matmul %13, %10, %cst_11 {dimension_numbers = #tpu.dot_dimension_numbers<[1], [0], [0], [1], [0, 0, 1, 1], [], []>} : vector<8x32xbf16>, vector<32x32xbf16>, vector<8x32xf32> -> vector<8x32xf32>
    %cst_12 = arith.constant dense<0.000000e+00> : vector<8x32xf32>
    %16 = tpu.matmul %13, %12, %cst_12 {dimension_numbers = #tpu.dot_dimension_numbers<[1], [0], [0], [1], [0, 0, 1, 1], [], []>} : vector<8x32xbf16>, vector<32x32xbf16>, vector<8x32xf32> -> vector<8x32xf32>
    %c0_13 = arith.constant 0 : index
    %c0_14 = arith.constant 0 : index
    %c0_15 = arith.constant 0 : index
    %c0_16 = arith.constant 0 : index
    %17 = vector.load %arg1[%c0_13, %c0_14, %c0_15, %c0_16] : memref<8x3x8x32xbf16, #tpu.memory_space<vmem>>, vector<1x1x8x32xbf16>
    %18 = vector.shape_cast %17 : vector<1x1x8x32xbf16> to vector<8x32xbf16>
    %19 = arith.extf %18 : vector<8x32xbf16> to vector<8x32xf32>
    %20 = arith.addf %19, %14 : vector<8x32xf32>
    %cst_17 = arith.constant 5.000000e-01 : f32
    %21 = vector.broadcast %cst_17 : f32 to vector<8x32xf32>
    %22 = arith.mulf %21, %20 : vector<8x32xf32>
    %23 = math.tanh %22 : vector<8x32xf32>
    %cst_18 = arith.constant 1.000000e+00 : f32
    %24 = vector.broadcast %cst_18 : f32 to vector<8x32xf32>
    %25 = arith.addf %23, %24 : vector<8x32xf32>
    %cst_19 = arith.constant 5.000000e-01 : f32
    %26 = vector.broadcast %cst_19 : f32 to vector<8x32xf32>
    %27 = arith.mulf %26, %25 : vector<8x32xf32>
    %c0_20 = arith.constant 0 : index
    %c1_21 = arith.constant 1 : index
    %c0_22 = arith.constant 0 : index
    %c0_23 = arith.constant 0 : index
    %28 = vector.load %arg1[%c0_20, %c1_21, %c0_22, %c0_23] : memref<8x3x8x32xbf16, #tpu.memory_space<vmem>>, vector<1x1x8x32xbf16>
    %29 = vector.shape_cast %28 : vector<1x1x8x32xbf16> to vector<8x32xbf16>
    %30 = arith.extf %29 : vector<8x32xbf16> to vector<8x32xf32>
    %31 = arith.addf %30, %15 : vector<8x32xf32>
    %cst_24 = arith.constant 5.000000e-01 : f32
    %32 = vector.broadcast %cst_24 : f32 to vector<8x32xf32>
    %33 = arith.mulf %32, %31 : vector<8x32xf32>
    %34 = math.tanh %33 : vector<8x32xf32>
    %cst_25 = arith.constant 1.000000e+00 : f32
    %35 = vector.broadcast %cst_25 : f32 to vector<8x32xf32>
    %36 = arith.addf %34, %35 : vector<8x32xf32>
    %cst_26 = arith.constant 5.000000e-01 : f32
    %37 = vector.broadcast %cst_26 : f32 to vector<8x32xf32>
    %38 = arith.mulf %37, %36 : vector<8x32xf32>
    %c0_27 = arith.constant 0 : index
    %c2_28 = arith.constant 2 : index
    %c0_29 = arith.constant 0 : index
    %c0_30 = arith.constant 0 : index
    %39 = vector.load %arg1[%c0_27, %c2_28, %c0_29, %c0_30] : memref<8x3x8x32xbf16, #tpu.memory_space<vmem>>, vector<1x1x8x32xbf16>
    %40 = vector.shape_cast %39 : vector<1x1x8x32xbf16> to vector<8x32xbf16>
    %41 = arith.extf %40 : vector<8x32xbf16> to vector<8x32xf32>
    %42 = arith.addf %16, %6 : vector<8x32xf32>
    %43 = arith.mulf %27, %42 : vector<8x32xf32>
    %44 = arith.addf %41, %43 : vector<8x32xf32>
    %45 = math.tanh %44 : vector<8x32xf32>
    %46 = arith.subf %3, %45 : vector<8x32xf32>
    %47 = arith.mulf %38, %46 : vector<8x32xf32>
    %48 = arith.addf %45, %47 : vector<8x32xf32>
    %c0_31 = arith.constant 0 : index
    %c0_32 = arith.constant 0 : index
    %c0_33 = arith.constant 0 : index
    %49 = vector.load %arg5[%c0_31, %c0_32, %c0_33] : memref<1x8x256xf32, #tpu.memory_space<vmem>>, vector<1x8x32xf32>
    %50 = vector.shape_cast %49 : vector<1x8x32xf32> to vector<8x32xf32>
    %51 = vector.shape_cast %48 : vector<8x32xf32> to vector<1x8x32xf32>
    tpu.vector_store %arg5[%c0_31, %c0_32, %c0_33], %51 {strides = array<i32>} : memref<1x8x256xf32, #tpu.memory_space<vmem>>, vector<1x8x32xf32>,
    %52 = arith.truncf %48 : vector<8x32xf32> to vector<8x32xbf16>
    %cst_34 = arith.constant dense<0.000000e+00> : vector<8x32xf32>
    %53 = tpu.matmul %52, %8, %cst_34 {dimension_numbers = #tpu.dot_dimension_numbers<[1], [0], [0], [1], [0, 0, 1, 1], [], []>} : vector<8x32xbf16>, vector<32x32xbf16>, vector<8x32xf32> -> vector<8x32xf32>
    %cst_35 = arith.constant dense<0.000000e+00> : vector<8x32xf32>
    %54 = tpu.matmul %52, %10, %cst_35 {dimension_numbers = #tpu.dot_dimension_numbers<[1], [0], [0], [1], [0, 0, 1, 1], [], []>} : vector<8x32xbf16>, vector<32x32xbf16>, vector<8x32xf32> -> vector<8x32xf32>
    %cst_36 = arith.constant dense<0.000000e+00> : vector<8x32xf32>
    %55 = tpu.matmul %52, %12, %cst_36 {dimension_numbers = #tpu.dot_dimension_numbers<[1], [0], [0], [1], [0, 0, 1, 1], [], []>} : vector<8x32xbf16>, vector<32x32xbf16>, vector<8x32xf32> -> vector<8x32xf32>
    %c1_37 = arith.constant 1 : index
    %c0_38 = arith.constant 0 : index
    %c0_39 = arith.constant 0 : index
    %c0_40 = arith.constant 0 : index
    %56 = vector.load %arg1[%c1_37, %c0_38, %c0_39, %c0_40] : memref<8x3x8x32xbf16, #tpu.memory_space<vmem>>, vector<1x1x8x32xbf16>
    %57 = vector.shape_cast %56 : vector<1x1x8x32xbf16> to vector<8x32xbf16>
    %58 = arith.extf %57 : vector<8x32xbf16> to vector<8x32xf32>
    %59 = arith.addf %58, %53 : vector<8x32xf32>
    %cst_41 = arith.constant 5.000000e-01 : f32
    %60 = vector.broadcast %cst_41 : f32 to vector<8x32xf32>
    %61 = arith.mulf %60, %59 : vector<8x32xf32>
    %62 = math.tanh %61 : vector<8x32xf32>
    %cst_42 = arith.constant 1.000000e+00 : f32
    %63 = vector.broadcast %cst_42 : f32 to vector<8x32xf32>
    %64 = arith.addf %62, %63 : vector<8x32xf32>
    %cst_43 = arith.constant 5.000000e-01 : f32
    %65 = vector.broadcast %cst_43 : f32 to vector<8x32xf32>
    %66 = arith.mulf %65, %64 : vector<8x32xf32>
    %c1_44 = arith.constant 1 : index
    %c1_45 = arith.constant 1 : index
    %c0_46 = arith.constant 0 : index
    %c0_47 = arith.constant 0 : index
    %67 = vector.load %arg1[%c1_44, %c1_45, %c0_46, %c0_47] : memref<8x3x8x32xbf16, #tpu.memory_space<vmem>>, vector<1x1x8x32xbf16>
    %68 = vector.shape_cast %67 : vector<1x1x8x32xbf16> to vector<8x32xbf16>
    %69 = arith.extf %68 : vector<8x32xbf16> to vector<8x32xf32>
    %70 = arith.addf %69, %54 : vector<8x32xf32>
    %cst_48 = arith.constant 5.000000e-01 : f32
    %71 = vector.broadcast %cst_48 : f32 to vector<8x32xf32>
    %72 = arith.mulf %71, %70 : vector<8x32xf32>
    %73 = math.tanh %72 : vector<8x32xf32>
    %cst_49 = arith.constant 1.000000e+00 : f32
    %74 = vector.broadcast %cst_49 : f32 to vector<8x32xf32>
    %75 = arith.addf %73, %74 : vector<8x32xf32>
    %cst_50 = arith.constant 5.000000e-01 : f32
    %76 = vector.broadcast %cst_50 : f32 to vector<8x32xf32>
    %77 = arith.mulf %76, %75 : vector<8x32xf32>
    %c1_51 = arith.constant 1 : index
    %c2_52 = arith.constant 2 : index
    %c0_53 = arith.constant 0 : index
    %c0_54 = arith.constant 0 : index
    %78 = vector.load %arg1[%c1_51, %c2_52, %c0_53, %c0_54] : memref<8x3x8x32xbf16, #tpu.memory_space<vmem>>, vector<1x1x8x32xbf16>
    %79 = vector.shape_cast %78 : vector<1x1x8x32xbf16> to vector<8x32xbf16>
    %80 = arith.extf %79 : vector<8x32xbf16> to vector<8x32xf32>
    %81 = arith.addf %55, %6 : vector<8x32xf32>
    %82 = arith.mulf %66, %81 : vector<8x32xf32>
    %83 = arith.addf %80, %82 : vector<8x32xf32>
    %84 = math.tanh %83 : vector<8x32xf32>
    %85 = arith.subf %48, %84 : vector<8x32xf32>
    %86 = arith.mulf %77, %85 : vector<8x32xf32>
    %87 = arith.addf %84, %86 : vector<8x32xf32>
    %c0_55 = arith.constant 0 : index
    %c0_56 = arith.constant 0 : index
    %c32 = arith.constant 32 : index
    %88 = vector.load %arg5[%c0_55, %c0_56, %c32] : memref<1x8x256xf32, #tpu.memory_space<vmem>>, vector<1x8x32xf32>
    %89 = vector.shape_cast %88 : vector<1x8x32xf32> to vector<8x32xf32>
    %90 = vector.shape_cast %87 : vector<8x32xf32> to vector<1x8x32xf32>
    tpu.vector_store %arg5[%c0_55, %c0_56, %c32], %90 {strides = array<i32>} : memref<1x8x256xf32, #tpu.memory_space<vmem>>, vector<1x8x32xf32>,
    %91 = arith.truncf %87 : vector<8x32xf32> to vector<8x32xbf16>
    %cst_57 = arith.constant dense<0.000000e+00> : vector<8x32xf32>
    %92 = tpu.matmul %91, %8, %cst_57 {dimension_numbers = #tpu.dot_dimension_numbers<[1], [0], [0], [1], [0, 0, 1, 1], [], []>} : vector<8x32xbf16>, vector<32x32xbf16>, vector<8x32xf32> -> vector<8x32xf32>
    %cst_58 = arith.constant dense<0.000000e+00> : vector<8x32xf32>
    %93 = tpu.matmul %91, %10, %cst_58 {dimension_numbers = #tpu.dot_dimension_numbers<[1], [0], [0], [1], [0, 0, 1, 1], [], []>} : vector<8x32xbf16>, vector<32x32xbf16>, vector<8x32xf32> -> vector<8x32xf32>
    %cst_59 = arith.constant dense<0.000000e+00> : vector<8x32xf32>
    %94 = tpu.matmul %91, %12, %cst_59 {dimension_numbers = #tpu.dot_dimension_numbers<[1], [0], [0], [1], [0, 0, 1, 1], [], []>} : vector<8x32xbf16>, vector<32x32xbf16>, vector<8x32xf32> -> vector<8x32xf32>
    %c2_60 = arith.constant 2 : index
    %c0_61 = arith.constant 0 : index
    %c0_62 = arith.constant 0 : index
    %c0_63 = arith.constant 0 : index
    %95 = vector.load %arg1[%c2_60, %c0_61, %c0_62, %c0_63] : memref<8x3x8x32xbf16, #tpu.memory_space<vmem>>, vector<1x1x8x32xbf16>
    %96 = vector.shape_cast %95 : vector<1x1x8x32xbf16> to vector<8x32xbf16>
    %97 = arith.extf %96 : vector<8x32xbf16> to vector<8x32xf32>
    %98 = arith.addf %97, %92 : vector<8x32xf32>
    %cst_64 = arith.constant 5.000000e-01 : f32
    %99 = vector.broadcast %cst_64 : f32 to vector<8x32xf32>
    %100 = arith.mulf %99, %98 : vector<8x32xf32>
    %101 = math.tanh %100 : vector<8x32xf32>
    %cst_65 = arith.constant 1.000000e+00 : f32
    %102 = vector.broadcast %cst_65 : f32 to vector<8x32xf32>
    %103 = arith.addf %101, %102 : vector<8x32xf32>
    %cst_66 = arith.constant 5.000000e-01 : f32
    %104 = vector.broadcast %cst_66 : f32 to vector<8x32xf32>
    %105 = arith.mulf %104, %103 : vector<8x32xf32>
    %c2_67 = arith.constant 2 : index
    %c1_68 = arith.constant 1 : index
    %c0_69 = arith.constant 0 : index
    %c0_70 = arith.constant 0 : index
    %106 = vector.load %arg1[%c2_67, %c1_68, %c0_69, %c0_70] : memref<8x3x8x32xbf16, #tpu.memory_space<vmem>>, vector<1x1x8x32xbf16>
    %107 = vector.shape_cast %106 : vector<1x1x8x32xbf16> to vector<8x32xbf16>
    %108 = arith.extf %107 : vector<8x32xbf16> to vector<8x32xf32>
    %109 = arith.addf %108, %93 : vector<8x32xf32>
    %cst_71 = arith.constant 5.000000e-01 : f32
    %110 = vector.broadcast %cst_71 : f32 to vector<8x32xf32>
    %111 = arith.mulf %110, %109 : vector<8x32xf32>
    %112 = math.tanh %111 : vector<8x32xf32>
    %cst_72 = arith.constant 1.000000e+00 : f32
    %113 = vector.broadcast %cst_72 : f32 to vector<8x32xf32>
    %114 = arith.addf %112, %113 : vector<8x32xf32>
    %cst_73 = arith.constant 5.000000e-01 : f32
    %115 = vector.broadcast %cst_73 : f32 to vector<8x32xf32>
    %116 = arith.mulf %115, %114 : vector<8x32xf32>
    %c2_74 = arith.constant 2 : index
    %c2_75 = arith.constant 2 : index
    %c0_76 = arith.constant 0 : index
    %c0_77 = arith.constant 0 : index
    %117 = vector.load %arg1[%c2_74, %c2_75, %c0_76, %c0_77] : memref<8x3x8x32xbf16, #tpu.memory_space<vmem>>, vector<1x1x8x32xbf16>
    %118 = vector.shape_cast %117 : vector<1x1x8x32xbf16> to vector<8x32xbf16>
    %119 = arith.extf %118 : vector<8x32xbf16> to vector<8x32xf32>
    %120 = arith.addf %94, %6 : vector<8x32xf32>
    %121 = arith.mulf %105, %120 : vector<8x32xf32>
    %122 = arith.addf %119, %121 : vector<8x32xf32>
    %123 = math.tanh %122 : vector<8x32xf32>
    %124 = arith.subf %87, %123 : vector<8x32xf32>
    %125 = arith.mulf %116, %124 : vector<8x32xf32>
    %126 = arith.addf %123, %125 : vector<8x32xf32>
    %c0_78 = arith.constant 0 : index
    %c0_79 = arith.constant 0 : index
    %c64 = arith.constant 64 : index
    %127 = vector.load %arg5[%c0_78, %c0_79, %c64] : memref<1x8x256xf32, #tpu.memory_space<vmem>>, vector<1x8x32xf32>
    %128 = vector.shape_cast %127 : vector<1x8x32xf32> to vector<8x32xf32>
    %129 = vector.shape_cast %126 : vector<8x32xf32> to vector<1x8x32xf32>
    tpu.vector_store %arg5[%c0_78, %c0_79, %c64], %129 {strides = array<i32>} : memref<1x8x256xf32, #tpu.memory_space<vmem>>, vector<1x8x32xf32>,
    %130 = arith.truncf %126 : vector<8x32xf32> to vector<8x32xbf16>
    %cst_80 = arith.constant dense<0.000000e+00> : vector<8x32xf32>
    %131 = tpu.matmul %130, %8, %cst_80 {dimension_numbers = #tpu.dot_dimension_numbers<[1], [0], [0], [1], [0, 0, 1, 1], [], []>} : vector<8x32xbf16>, vector<32x32xbf16>, vector<8x32xf32> -> vector<8x32xf32>
    %cst_81 = arith.constant dense<0.000000e+00> : vector<8x32xf32>
    %132 = tpu.matmul %130, %10, %cst_81 {dimension_numbers = #tpu.dot_dimension_numbers<[1], [0], [0], [1], [0, 0, 1, 1], [], []>} : vector<8x32xbf16>, vector<32x32xbf16>, vector<8x32xf32> -> vector<8x32xf32>
    %cst_82 = arith.constant dense<0.000000e+00> : vector<8x32xf32>
    %133 = tpu.matmul %130, %12, %cst_82 {dimension_numbers = #tpu.dot_dimension_numbers<[1], [0], [0], [1], [0, 0, 1, 1], [], []>} : vector<8x32xbf16>, vector<32x32xbf16>, vector<8x32xf32> -> vector<8x32xf32>
    %c3 = arith.constant 3 : index
    %c0_83 = arith.constant 0 : index
    %c0_84 = arith.constant 0 : index
    %c0_85 = arith.constant 0 : index
    %134 = vector.load %arg1[%c3, %c0_83, %c0_84, %c0_85] : memref<8x3x8x32xbf16, #tpu.memory_space<vmem>>, vector<1x1x8x32xbf16>
    %135 = vector.shape_cast %134 : vector<1x1x8x32xbf16> to vector<8x32xbf16>
    %136 = arith.extf %135 : vector<8x32xbf16> to vector<8x32xf32>
    %137 = arith.addf %136, %131 : vector<8x32xf32>
    %cst_86 = arith.constant 5.000000e-01 : f32
    %138 = vector.broadcast %cst_86 : f32 to vector<8x32xf32>
    %139 = arith.mulf %138, %137 : vector<8x32xf32>
    %140 = math.tanh %139 : vector<8x32xf32>
    %cst_87 = arith.constant 1.000000e+00 : f32
    %141 = vector.broadcast %cst_87 : f32 to vector<8x32xf32>
    %142 = arith.addf %140, %141 : vector<8x32xf32>
    %cst_88 = arith.constant 5.000000e-01 : f32
    %143 = vector.broadcast %cst_88 : f32 to vector<8x32xf32>
    %144 = arith.mulf %143, %142 : vector<8x32xf32>
    %c3_89 = arith.constant 3 : index
    %c1_90 = arith.constant 1 : index
    %c0_91 = arith.constant 0 : index
    %c0_92 = arith.constant 0 : index
    %145 = vector.load %arg1[%c3_89, %c1_90, %c0_91, %c0_92] : memref<8x3x8x32xbf16, #tpu.memory_space<vmem>>, vector<1x1x8x32xbf16>
    %146 = vector.shape_cast %145 : vector<1x1x8x32xbf16> to vector<8x32xbf16>
    %147 = arith.extf %146 : vector<8x32xbf16> to vector<8x32xf32>
    %148 = arith.addf %147, %132 : vector<8x32xf32>
    %cst_93 = arith.constant 5.000000e-01 : f32
    %149 = vector.broadcast %cst_93 : f32 to vector<8x32xf32>
    %150 = arith.mulf %149, %148 : vector<8x32xf32>
    %151 = math.tanh %150 : vector<8x32xf32>
    %cst_94 = arith.constant 1.000000e+00 : f32
    %152 = vector.broadcast %cst_94 : f32 to vector<8x32xf32>
    %153 = arith.addf %151, %152 : vector<8x32xf32>
    %cst_95 = arith.constant 5.000000e-01 : f32
    %154 = vector.broadcast %cst_95 : f32 to vector<8x32xf32>
    %155 = arith.mulf %154, %153 : vector<8x32xf32>
    %c3_96 = arith.constant 3 : index
    %c2_97 = arith.constant 2 : index
    %c0_98 = arith.constant 0 : index
    %c0_99 = arith.constant 0 : index
    %156 = vector.load %arg1[%c3_96, %c2_97, %c0_98, %c0_99] : memref<8x3x8x32xbf16, #tpu.memory_space<vmem>>, vector<1x1x8x32xbf16>
    %157 = vector.shape_cast %156 : vector<1x1x8x32xbf16> to vector<8x32xbf16>
    %158 = arith.extf %157 : vector<8x32xbf16> to vector<8x32xf32>
    %159 = arith.addf %133, %6 : vector<8x32xf32>
    %160 = arith.mulf %144, %159 : vector<8x32xf32>
    %161 = arith.addf %158, %160 : vector<8x32xf32>
    %162 = math.tanh %161 : vector<8x32xf32>
    %163 = arith.subf %126, %162 : vector<8x32xf32>
    %164 = arith.mulf %155, %163 : vector<8x32xf32>
    %165 = arith.addf %162, %164 : vector<8x32xf32>
    %c0_100 = arith.constant 0 : index
    %c0_101 = arith.constant 0 : index
    %c96 = arith.constant 96 : index
    %166 = vector.load %arg5[%c0_100, %c0_101, %c96] : memref<1x8x256xf32, #tpu.memory_space<vmem>>, vector<1x8x32xf32>
    %167 = vector.shape_cast %166 : vector<1x8x32xf32> to vector<8x32xf32>
    %168 = vector.shape_cast %165 : vector<8x32xf32> to vector<1x8x32xf32>
    tpu.vector_store %arg5[%c0_100, %c0_101, %c96], %168 {strides = array<i32>} : memref<1x8x256xf32, #tpu.memory_space<vmem>>, vector<1x8x32xf32>,
    %169 = arith.truncf %165 : vector<8x32xf32> to vector<8x32xbf16>
    %cst_102 = arith.constant dense<0.000000e+00> : vector<8x32xf32>
    %170 = tpu.matmul %169, %8, %cst_102 {dimension_numbers = #tpu.dot_dimension_numbers<[1], [0], [0], [1], [0, 0, 1, 1], [], []>} : vector<8x32xbf16>, vector<32x32xbf16>, vector<8x32xf32> -> vector<8x32xf32>
    %cst_103 = arith.constant dense<0.000000e+00> : vector<8x32xf32>
    %171 = tpu.matmul %169, %10, %cst_103 {dimension_numbers = #tpu.dot_dimension_numbers<[1], [0], [0], [1], [0, 0, 1, 1], [], []>} : vector<8x32xbf16>, vector<32x32xbf16>, vector<8x32xf32> -> vector<8x32xf32>
    %cst_104 = arith.constant dense<0.000000e+00> : vector<8x32xf32>
    %172 = tpu.matmul %169, %12, %cst_104 {dimension_numbers = #tpu.dot_dimension_numbers<[1], [0], [0], [1], [0, 0, 1, 1], [], []>} : vector<8x32xbf16>, vector<32x32xbf16>, vector<8x32xf32> -> vector<8x32xf32>
    %c4 = arith.constant 4 : index
    %c0_105 = arith.constant 0 : index
    %c0_106 = arith.constant 0 : index
    %c0_107 = arith.constant 0 : index
    %173 = vector.load %arg1[%c4, %c0_105, %c0_106, %c0_107] : memref<8x3x8x32xbf16, #tpu.memory_space<vmem>>, vector<1x1x8x32xbf16>
    %174 = vector.shape_cast %173 : vector<1x1x8x32xbf16> to vector<8x32xbf16>
    %175 = arith.extf %174 : vector<8x32xbf16> to vector<8x32xf32>
    %176 = arith.addf %175, %170 : vector<8x32xf32>
    %cst_108 = arith.constant 5.000000e-01 : f32
    %177 = vector.broadcast %cst_108 : f32 to vector<8x32xf32>
    %178 = arith.mulf %177, %176 : vector<8x32xf32>
    %179 = math.tanh %178 : vector<8x32xf32>
    %cst_109 = arith.constant 1.000000e+00 : f32
    %180 = vector.broadcast %cst_109 : f32 to vector<8x32xf32>
    %181 = arith.addf %179, %180 : vector<8x32xf32>
    %cst_110 = arith.constant 5.000000e-01 : f32
    %182 = vector.broadcast %cst_110 : f32 to vector<8x32xf32>
    %183 = arith.mulf %182, %181 : vector<8x32xf32>
    %c4_111 = arith.constant 4 : index
    %c1_112 = arith.constant 1 : index
    %c0_113 = arith.constant 0 : index
    %c0_114 = arith.constant 0 : index
    %184 = vector.load %arg1[%c4_111, %c1_112, %c0_113, %c0_114] : memref<8x3x8x32xbf16, #tpu.memory_space<vmem>>, vector<1x1x8x32xbf16>
    %185 = vector.shape_cast %184 : vector<1x1x8x32xbf16> to vector<8x32xbf16>
    %186 = arith.extf %185 : vector<8x32xbf16> to vector<8x32xf32>
    %187 = arith.addf %186, %171 : vector<8x32xf32>
    %cst_115 = arith.constant 5.000000e-01 : f32
    %188 = vector.broadcast %cst_115 : f32 to vector<8x32xf32>
    %189 = arith.mulf %188, %187 : vector<8x32xf32>
    %190 = math.tanh %189 : vector<8x32xf32>
    %cst_116 = arith.constant 1.000000e+00 : f32
    %191 = vector.broadcast %cst_116 : f32 to vector<8x32xf32>
    %192 = arith.addf %190, %191 : vector<8x32xf32>
    %cst_117 = arith.constant 5.000000e-01 : f32
    %193 = vector.broadcast %cst_117 : f32 to vector<8x32xf32>
    %194 = arith.mulf %193, %192 : vector<8x32xf32>
    %c4_118 = arith.constant 4 : index
    %c2_119 = arith.constant 2 : index
    %c0_120 = arith.constant 0 : index
    %c0_121 = arith.constant 0 : index
    %195 = vector.load %arg1[%c4_118, %c2_119, %c0_120, %c0_121] : memref<8x3x8x32xbf16, #tpu.memory_space<vmem>>, vector<1x1x8x32xbf16>
    %196 = vector.shape_cast %195 : vector<1x1x8x32xbf16> to vector<8x32xbf16>
    %197 = arith.extf %196 : vector<8x32xbf16> to vector<8x32xf32>
    %198 = arith.addf %172, %6 : vector<8x32xf32>
    %199 = arith.mulf %183, %198 : vector<8x32xf32>
    %200 = arith.addf %197, %199 : vector<8x32xf32>
    %201 = math.tanh %200 : vector<8x32xf32>
    %202 = arith.subf %165, %201 : vector<8x32xf32>
    %203 = arith.mulf %194, %202 : vector<8x32xf32>
    %204 = arith.addf %201, %203 : vector<8x32xf32>
    %c0_122 = arith.constant 0 : index
    %c0_123 = arith.constant 0 : index
    %c128 = arith.constant 128 : index
    %205 = vector.load %arg5[%c0_122, %c0_123, %c128] : memref<1x8x256xf32, #tpu.memory_space<vmem>>, vector<1x8x32xf32>
    %206 = vector.shape_cast %205 : vector<1x8x32xf32> to vector<8x32xf32>
    %207 = vector.shape_cast %204 : vector<8x32xf32> to vector<1x8x32xf32>
    tpu.vector_store %arg5[%c0_122, %c0_123, %c128], %207 {strides = array<i32>} : memref<1x8x256xf32, #tpu.memory_space<vmem>>, vector<1x8x32xf32>,
    %208 = arith.truncf %204 : vector<8x32xf32> to vector<8x32xbf16>
    %cst_124 = arith.constant dense<0.000000e+00> : vector<8x32xf32>
    %209 = tpu.matmul %208, %8, %cst_124 {dimension_numbers = #tpu.dot_dimension_numbers<[1], [0], [0], [1], [0, 0, 1, 1], [], []>} : vector<8x32xbf16>, vector<32x32xbf16>, vector<8x32xf32> -> vector<8x32xf32>
    %cst_125 = arith.constant dense<0.000000e+00> : vector<8x32xf32>
    %210 = tpu.matmul %208, %10, %cst_125 {dimension_numbers = #tpu.dot_dimension_numbers<[1], [0], [0], [1], [0, 0, 1, 1], [], []>} : vector<8x32xbf16>, vector<32x32xbf16>, vector<8x32xf32> -> vector<8x32xf32>
    %cst_126 = arith.constant dense<0.000000e+00> : vector<8x32xf32>
    %211 = tpu.matmul %208, %12, %cst_126 {dimension_numbers = #tpu.dot_dimension_numbers<[1], [0], [0], [1], [0, 0, 1, 1], [], []>} : vector<8x32xbf16>, vector<32x32xbf16>, vector<8x32xf32> -> vector<8x32xf32>
    %c5 = arith.constant 5 : index
    %c0_127 = arith.constant 0 : index
    %c0_128 = arith.constant 0 : index
    %c0_129 = arith.constant 0 : index
    %212 = vector.load %arg1[%c5, %c0_127, %c0_128, %c0_129] : memref<8x3x8x32xbf16, #tpu.memory_space<vmem>>, vector<1x1x8x32xbf16>
    %213 = vector.shape_cast %212 : vector<1x1x8x32xbf16> to vector<8x32xbf16>
    %214 = arith.extf %213 : vector<8x32xbf16> to vector<8x32xf32>
    %215 = arith.addf %214, %209 : vector<8x32xf32>
    %cst_130 = arith.constant 5.000000e-01 : f32
    %216 = vector.broadcast %cst_130 : f32 to vector<8x32xf32>
    %217 = arith.mulf %216, %215 : vector<8x32xf32>
    %218 = math.tanh %217 : vector<8x32xf32>
    %cst_131 = arith.constant 1.000000e+00 : f32
    %219 = vector.broadcast %cst_131 : f32 to vector<8x32xf32>
    %220 = arith.addf %218, %219 : vector<8x32xf32>
    %cst_132 = arith.constant 5.000000e-01 : f32
    %221 = vector.broadcast %cst_132 : f32 to vector<8x32xf32>
    %222 = arith.mulf %221, %220 : vector<8x32xf32>
    %c5_133 = arith.constant 5 : index
    %c1_134 = arith.constant 1 : index
    %c0_135 = arith.constant 0 : index
    %c0_136 = arith.constant 0 : index
    %223 = vector.load %arg1[%c5_133, %c1_134, %c0_135, %c0_136] : memref<8x3x8x32xbf16, #tpu.memory_space<vmem>>, vector<1x1x8x32xbf16>
    %224 = vector.shape_cast %223 : vector<1x1x8x32xbf16> to vector<8x32xbf16>
    %225 = arith.extf %224 : vector<8x32xbf16> to vector<8x32xf32>
    %226 = arith.addf %225, %210 : vector<8x32xf32>
    %cst_137 = arith.constant 5.000000e-01 : f32
    %227 = vector.broadcast %cst_137 : f32 to vector<8x32xf32>
    %228 = arith.mulf %227, %226 : vector<8x32xf32>
    %229 = math.tanh %228 : vector<8x32xf32>
    %cst_138 = arith.constant 1.000000e+00 : f32
    %230 = vector.broadcast %cst_138 : f32 to vector<8x32xf32>
    %231 = arith.addf %229, %230 : vector<8x32xf32>
    %cst_139 = arith.constant 5.000000e-01 : f32
    %232 = vector.broadcast %cst_139 : f32 to vector<8x32xf32>
    %233 = arith.mulf %232, %231 : vector<8x32xf32>
    %c5_140 = arith.constant 5 : index
    %c2_141 = arith.constant 2 : index
    %c0_142 = arith.constant 0 : index
    %c0_143 = arith.constant 0 : index
    %234 = vector.load %arg1[%c5_140, %c2_141, %c0_142, %c0_143] : memref<8x3x8x32xbf16, #tpu.memory_space<vmem>>, vector<1x1x8x32xbf16>
    %235 = vector.shape_cast %234 : vector<1x1x8x32xbf16> to vector<8x32xbf16>
    %236 = arith.extf %235 : vector<8x32xbf16> to vector<8x32xf32>
    %237 = arith.addf %211, %6 : vector<8x32xf32>
    %238 = arith.mulf %222, %237 : vector<8x32xf32>
    %239 = arith.addf %236, %238 : vector<8x32xf32>
    %240 = math.tanh %239 : vector<8x32xf32>
    %241 = arith.subf %204, %240 : vector<8x32xf32>
    %242 = arith.mulf %233, %241 : vector<8x32xf32>
    %243 = arith.addf %240, %242 : vector<8x32xf32>
    %c0_144 = arith.constant 0 : index
    %c0_145 = arith.constant 0 : index
    %c160 = arith.constant 160 : index
    %244 = vector.load %arg5[%c0_144, %c0_145, %c160] : memref<1x8x256xf32, #tpu.memory_space<vmem>>, vector<1x8x32xf32>
    %245 = vector.shape_cast %244 : vector<1x8x32xf32> to vector<8x32xf32>
    %246 = vector.shape_cast %243 : vector<8x32xf32> to vector<1x8x32xf32>
    tpu.vector_store %arg5[%c0_144, %c0_145, %c160], %246 {strides = array<i32>} : memref<1x8x256xf32, #tpu.memory_space<vmem>>, vector<1x8x32xf32>,
    %247 = arith.truncf %243 : vector<8x32xf32> to vector<8x32xbf16>
    %cst_146 = arith.constant dense<0.000000e+00> : vector<8x32xf32>
    %248 = tpu.matmul %247, %8, %cst_146 {dimension_numbers = #tpu.dot_dimension_numbers<[1], [0], [0], [1], [0, 0, 1, 1], [], []>} : vector<8x32xbf16>, vector<32x32xbf16>, vector<8x32xf32> -> vector<8x32xf32>
    %cst_147 = arith.constant dense<0.000000e+00> : vector<8x32xf32>
    %249 = tpu.matmul %247, %10, %cst_147 {dimension_numbers = #tpu.dot_dimension_numbers<[1], [0], [0], [1], [0, 0, 1, 1], [], []>} : vector<8x32xbf16>, vector<32x32xbf16>, vector<8x32xf32> -> vector<8x32xf32>
    %cst_148 = arith.constant dense<0.000000e+00> : vector<8x32xf32>
    %250 = tpu.matmul %247, %12, %cst_148 {dimension_numbers = #tpu.dot_dimension_numbers<[1], [0], [0], [1], [0, 0, 1, 1], [], []>} : vector<8x32xbf16>, vector<32x32xbf16>, vector<8x32xf32> -> vector<8x32xf32>
    %c6 = arith.constant 6 : index
    %c0_149 = arith.constant 0 : index
    %c0_150 = arith.constant 0 : index
    %c0_151 = arith.constant 0 : index
    %251 = vector.load %arg1[%c6, %c0_149, %c0_150, %c0_151] : memref<8x3x8x32xbf16, #tpu.memory_space<vmem>>, vector<1x1x8x32xbf16>
    %252 = vector.shape_cast %251 : vector<1x1x8x32xbf16> to vector<8x32xbf16>
    %253 = arith.extf %252 : vector<8x32xbf16> to vector<8x32xf32>
    %254 = arith.addf %253, %248 : vector<8x32xf32>
    %cst_152 = arith.constant 5.000000e-01 : f32
    %255 = vector.broadcast %cst_152 : f32 to vector<8x32xf32>
    %256 = arith.mulf %255, %254 : vector<8x32xf32>
    %257 = math.tanh %256 : vector<8x32xf32>
    %cst_153 = arith.constant 1.000000e+00 : f32
    %258 = vector.broadcast %cst_153 : f32 to vector<8x32xf32>
    %259 = arith.addf %257, %258 : vector<8x32xf32>
    %cst_154 = arith.constant 5.000000e-01 : f32
    %260 = vector.broadcast %cst_154 : f32 to vector<8x32xf32>
    %261 = arith.mulf %260, %259 : vector<8x32xf32>
    %c6_155 = arith.constant 6 : index
    %c1_156 = arith.constant 1 : index
    %c0_157 = arith.constant 0 : index
    %c0_158 = arith.constant 0 : index
    %262 = vector.load %arg1[%c6_155, %c1_156, %c0_157, %c0_158] : memref<8x3x8x32xbf16, #tpu.memory_space<vmem>>, vector<1x1x8x32xbf16>
    %263 = vector.shape_cast %262 : vector<1x1x8x32xbf16> to vector<8x32xbf16>
    %264 = arith.extf %263 : vector<8x32xbf16> to vector<8x32xf32>
    %265 = arith.addf %264, %249 : vector<8x32xf32>
    %cst_159 = arith.constant 5.000000e-01 : f32
    %266 = vector.broadcast %cst_159 : f32 to vector<8x32xf32>
    %267 = arith.mulf %266, %265 : vector<8x32xf32>
    %268 = math.tanh %267 : vector<8x32xf32>
    %cst_160 = arith.constant 1.000000e+00 : f32
    %269 = vector.broadcast %cst_160 : f32 to vector<8x32xf32>
    %270 = arith.addf %268, %269 : vector<8x32xf32>
    %cst_161 = arith.constant 5.000000e-01 : f32
    %271 = vector.broadcast %cst_161 : f32 to vector<8x32xf32>
    %272 = arith.mulf %271, %270 : vector<8x32xf32>
    %c6_162 = arith.constant 6 : index
    %c2_163 = arith.constant 2 : index
    %c0_164 = arith.constant 0 : index
    %c0_165 = arith.constant 0 : index
    %273 = vector.load %arg1[%c6_162, %c2_163, %c0_164, %c0_165] : memref<8x3x8x32xbf16, #tpu.memory_space<vmem>>, vector<1x1x8x32xbf16>
    %274 = vector.shape_cast %273 : vector<1x1x8x32xbf16> to vector<8x32xbf16>
    %275 = arith.extf %274 : vector<8x32xbf16> to vector<8x32xf32>
    %276 = arith.addf %250, %6 : vector<8x32xf32>
    %277 = arith.mulf %261, %276 : vector<8x32xf32>
    %278 = arith.addf %275, %277 : vector<8x32xf32>
    %279 = math.tanh %278 : vector<8x32xf32>
    %280 = arith.subf %243, %279 : vector<8x32xf32>
    %281 = arith.mulf %272, %280 : vector<8x32xf32>
    %282 = arith.addf %279, %281 : vector<8x32xf32>
    %c0_166 = arith.constant 0 : index
    %c0_167 = arith.constant 0 : index
    %c192 = arith.constant 192 : index
    %283 = vector.load %arg5[%c0_166, %c0_167, %c192] : memref<1x8x256xf32, #tpu.memory_space<vmem>>, vector<1x8x32xf32>
    %284 = vector.shape_cast %283 : vector<1x8x32xf32> to vector<8x32xf32>
    %285 = vector.shape_cast %282 : vector<8x32xf32> to vector<1x8x32xf32>
    tpu.vector_store %arg5[%c0_166, %c0_167, %c192], %285 {strides = array<i32>} : memref<1x8x256xf32, #tpu.memory_space<vmem>>, vector<1x8x32xf32>,
    %286 = arith.truncf %282 : vector<8x32xf32> to vector<8x32xbf16>
    %cst_168 = arith.constant dense<0.000000e+00> : vector<8x32xf32>
    %287 = tpu.matmul %286, %8, %cst_168 {dimension_numbers = #tpu.dot_dimension_numbers<[1], [0], [0], [1], [0, 0, 1, 1], [], []>} : vector<8x32xbf16>, vector<32x32xbf16>, vector<8x32xf32> -> vector<8x32xf32>
    %cst_169 = arith.constant dense<0.000000e+00> : vector<8x32xf32>
    %288 = tpu.matmul %286, %10, %cst_169 {dimension_numbers = #tpu.dot_dimension_numbers<[1], [0], [0], [1], [0, 0, 1, 1], [], []>} : vector<8x32xbf16>, vector<32x32xbf16>, vector<8x32xf32> -> vector<8x32xf32>
    %cst_170 = arith.constant dense<0.000000e+00> : vector<8x32xf32>
    %289 = tpu.matmul %286, %12, %cst_170 {dimension_numbers = #tpu.dot_dimension_numbers<[1], [0], [0], [1], [0, 0, 1, 1], [], []>} : vector<8x32xbf16>, vector<32x32xbf16>, vector<8x32xf32> -> vector<8x32xf32>
    %c7 = arith.constant 7 : index
    %c0_171 = arith.constant 0 : index
    %c0_172 = arith.constant 0 : index
    %c0_173 = arith.constant 0 : index
    %290 = vector.load %arg1[%c7, %c0_171, %c0_172, %c0_173] : memref<8x3x8x32xbf16, #tpu.memory_space<vmem>>, vector<1x1x8x32xbf16>
    %291 = vector.shape_cast %290 : vector<1x1x8x32xbf16> to vector<8x32xbf16>
    %292 = arith.extf %291 : vector<8x32xbf16> to vector<8x32xf32>
    %293 = arith.addf %292, %287 : vector<8x32xf32>
    %cst_174 = arith.constant 5.000000e-01 : f32
    %294 = vector.broadcast %cst_174 : f32 to vector<8x32xf32>
    %295 = arith.mulf %294, %293 : vector<8x32xf32>
    %296 = math.tanh %295 : vector<8x32xf32>
    %cst_175 = arith.constant 1.000000e+00 : f32
    %297 = vector.broadcast %cst_175 : f32 to vector<8x32xf32>
    %298 = arith.addf %296, %297 : vector<8x32xf32>
    %cst_176 = arith.constant 5.000000e-01 : f32
    %299 = vector.broadcast %cst_176 : f32 to vector<8x32xf32>
    %300 = arith.mulf %299, %298 : vector<8x32xf32>
    %c7_177 = arith.constant 7 : index
    %c1_178 = arith.constant 1 : index
    %c0_179 = arith.constant 0 : index
    %c0_180 = arith.constant 0 : index
    %301 = vector.load %arg1[%c7_177, %c1_178, %c0_179, %c0_180] : memref<8x3x8x32xbf16, #tpu.memory_space<vmem>>, vector<1x1x8x32xbf16>
    %302 = vector.shape_cast %301 : vector<1x1x8x32xbf16> to vector<8x32xbf16>
    %303 = arith.extf %302 : vector<8x32xbf16> to vector<8x32xf32>
    %304 = arith.addf %303, %288 : vector<8x32xf32>
    %cst_181 = arith.constant 5.000000e-01 : f32
    %305 = vector.broadcast %cst_181 : f32 to vector<8x32xf32>
    %306 = arith.mulf %305, %304 : vector<8x32xf32>
    %307 = math.tanh %306 : vector<8x32xf32>
    %cst_182 = arith.constant 1.000000e+00 : f32
    %308 = vector.broadcast %cst_182 : f32 to vector<8x32xf32>
    %309 = arith.addf %307, %308 : vector<8x32xf32>
    %cst_183 = arith.constant 5.000000e-01 : f32
    %310 = vector.broadcast %cst_183 : f32 to vector<8x32xf32>
    %311 = arith.mulf %310, %309 : vector<8x32xf32>
    %c7_184 = arith.constant 7 : index
    %c2_185 = arith.constant 2 : index
    %c0_186 = arith.constant 0 : index
    %c0_187 = arith.constant 0 : index
    %312 = vector.load %arg1[%c7_184, %c2_185, %c0_186, %c0_187] : memref<8x3x8x32xbf16, #tpu.memory_space<vmem>>, vector<1x1x8x32xbf16>
    %313 = vector.shape_cast %312 : vector<1x1x8x32xbf16> to vector<8x32xbf16>
    %314 = arith.extf %313 : vector<8x32xbf16> to vector<8x32xf32>
    %315 = arith.addf %289, %6 : vector<8x32xf32>
    %316 = arith.mulf %300, %315 : vector<8x32xf32>
    %317 = arith.addf %314, %316 : vector<8x32xf32>
    %318 = math.tanh %317 : vector<8x32xf32>
    %319 = arith.subf %282, %318 : vector<8x32xf32>
    %320 = arith.mulf %311, %319 : vector<8x32xf32>
    %321 = arith.addf %318, %320 : vector<8x32xf32>
    %c0_188 = arith.constant 0 : index
    %c0_189 = arith.constant 0 : index
    %c224 = arith.constant 224 : index
    %322 = vector.load %arg5[%c0_188, %c0_189, %c224] : memref<1x8x256xf32, #tpu.memory_space<vmem>>, vector<1x8x32xf32>
    %323 = vector.shape_cast %322 : vector<1x8x32xf32> to vector<8x32xf32>
    %324 = vector.shape_cast %321 : vector<8x32xf32> to vector<1x8x32xf32>
    tpu.vector_store %arg5[%c0_188, %c0_189, %c224], %324 {strides = array<i32>} : memref<1x8x256xf32, #tpu.memory_space<vmem>>, vector<1x8x32xf32>,
    %c0_190 = arith.constant 0 : index
    %c0_191 = arith.constant 0 : index
    %325 = vector.load %arg6[%c0_190, %c0_191] : memref<8x32xf32, #tpu.memory_space<vmem>>, vector<8x32xf32>
    tpu.vector_store %arg6[%c0_190, %c0_191], %321 {strides = array<i32>} : memref<8x32xf32, #tpu.memory_space<vmem>>, vector<8x32xf32>,
    return
  }
  func.func @transform_0(%arg0: i32) -> (i32, i32, i32, i32) {
    %c0_i32 = arith.constant 0 : i32
    %c0_i32_0 = arith.constant 0 : i32
    %c0_i32_1 = arith.constant 0 : i32
    %c0_i32_2 = arith.constant 0 : i32
    return %arg0, %c0_i32, %c0_i32_0, %c0_i32_1 : i32, i32, i32, i32
  }
  func.func @transform_4(%arg0: i32) -> (i32, i32, i32) {
    %c0_i32 = arith.constant 0 : i32
    %c0_i32_0 = arith.constant 0 : i32
    %c0_i32_1 = arith.constant 0 : i32
    return %arg0, %c0_i32, %c0_i32_0 : i32, i32, i32
  }
}

</mosaic_0001>

<bundles_post_ra>
// kernel: centralized_stack_forward.1
= control target key start
LH: loop header
LB: loop body
LE: loop exit
PB: predicated region body
PF: predicated region fallthrough
CT: control target
= control target key end

     0   :  { %s2166_s0 = inlined_call_operand.vmem [shape: bf16[8,3,8,32], index: 0, kind: input, shape index: {}]   ;;  %s2167_s1 = inlined_call_operand.vmem [shape: f32[8,32], index: 1, kind: input, shape index: {}]   ;;  %s2168_s2 = inlined_call_operand.vmem [shape: bf16[3,32,32], index: 2, kind: input, shape index: {}]   ;;  %s2169_s3 = inlined_call_operand.vmem [shape: f32[1,32], index: 3, kind: input, shape index: {}]   ;;  %s2170_s4 = inlined_call_operand.vmem [shape: f32[1,8,256], index: 4, kind: output, shape index: {}]  }
   0x1   :  { %v1868_v0 = vld [vmem:[%s2168_s2] sm:$0xff]  ;;  %v1873_v1 = vld [vmem:[%s2168_s2 + $0x8] sm:$0xff]  ;;  %v1878_v2 = vld [vmem:[%s2168_s2 + $0x10] sm:$0xff] }
   0x2   :  { %v1883_v3 = vld [vmem:[%s2168_s2 + $0x18] sm:$0xff]  ;;  %v1888_v4 = vld [vmem:[%s2168_s2 + $0x20] sm:$0xff]  ;;  %v1893_v5 = vld [vmem:[%s2168_s2 + $0x28] sm:$0xff] }
   0x3   :  { %67 = vsyncadd [#allocation5], 768  ;;  %v86_v6 = vld [vmem:[%s2169_s3] sm:$0x1] }
   0x4   :  { %87 = vst [vmem:[#allocation4] sm:$0x1] %v86_v6 }
   0x5   :  { %112 = vsyncadd [#allocation5 + $0x1], 16  ;;  %v146_v7 = vld [vmem:[%s2167_s1] sm:$0xff] }
   0x6   :  { %147 = vst [vmem:[#allocation2] sm:$0xff] %v146_v7 }
   0x7   :  { %155 = vsyncadd [#allocation5 + $0x2], 128 }
   0x8   :  { %1829 = dma.done.wait [#allocation5 + $0x2], 128 }
   0x9   :  { %1830 = vsyncadd [#allocation5 + $0x2], 4294967168 }
   0xa   :  { %1831 = dma.done.wait [#allocation5 + $0x1], 16 }
   0xb   :  { %1832 = vsyncadd [#allocation5 + $0x1], 4294967280 }
   0xc   :  { %1833 = dma.done.wait [#allocation5], 768 }
   0xd   :  { %1834 = vsyncadd [#allocation5], 4294966528  ;;  %v1835_v8 = vmov 0.0   ;;  %vm1836_vm0 = vmmov 0   ;;  %v167_v9 = vld [vmem:[#allocation2] sm:$0xff]  ;;  %vm184_vm1 = vcmask 261120  }
   0xe   :  { %1584 = vmatprep.subr.bf16.mxu0 %v1835_v8  ;;  %1588 = vmatprep.mubr.msk.bf16.mxu0 %vm1836_vm0, %v1835_v8  ;;  %v183_v10 = vpack.c.bf16 %v167_v9, %v167_v9  ;;  %v268_v11 = vld [vmem:[%s2166_s0] sm:$0xff]   ;;  %v1939_v30 = vld [vmem:[#allocation4] ss:$0 sm:$0xff]  ;;  %v1470_v56 = vld [vmem:[%s2166_s0 + $0x10] sm:$0xff]   ;;  %s1837_s10 = smov 32   ;;  %vm486_vm2 = vcmask 523520  }
   0xf   :  { %1585 = vmatpush3.bf16.msra.mxu0 %v1868_v0  ;;  %1592 = vmatprep.subr.bf16.mxu1 %v1835_v8  ;;  %v269_v12 = vunpack.c.l.bf16 %v268_v11  ;;  %v277_v23 = vunpack.c.h.bf16 %v268_v11  ;;  %v1465_v32 = vld [vmem:[%s2166_s0 + $0x8] sm:$0xff]   ;;  %v427_v59 = vunpack.c.l.bf16 %v1470_v56  ;;  %s1838_s17 = smov 64   ;;  %vm641_vm3 = vcmask 785920   ;;  %s1839_s30 = smov 96  }
  0x10   :  { %1586 = vmatprep.subr.bf16.mxu0 %v1835_v8  ;;  %1593 = vmatpush3.bf16.msra.mxu1 %v1878_v2  ;;  %v285_v36 = vunpack.c.l.bf16 %v1465_v32  ;;  %v419_v47 = vunpack.c.h.bf16 %v1465_v32  ;;  %vm796_vm4 = vcmask 1048320  }
  0x11   :  { %1594 = vmatprep.subr.bf16.mxu1 %v1835_v8  ;;  %1596 = vmatprep.mubr.msk.bf16.mxu1 %vm1836_vm0, %v1835_v8 }
  0x13   :  { %1587 = vmatpush3.bf16.msra.mxu0 %v1873_v1 }
  0x14   :  { %1600 = vmatprep.subr.bf16.mxu0 %v1835_v8  ;;  %1595 = vmatpush3.bf16.msra.mxu1 %v1883_v3 }
  0x15   :  { %1608 = vmatprep.subr.bf16.mxu1 %v1835_v8 }
  0x16   :  { %1589 = vmatmul.mubr.msk.bf16.vlgmr.msra.gmra.mrb[0].mxu0 %vm184_vm1, %v183_v10 }
  0x17   :  { %1597 = vmatmul.mubr.msk.bf16.vlgmr.msra.gmra.mrb[0].mxu1 %vm184_vm1, %v183_v10  ;;  %1601 = vmatpush3.bf16.msra.mxu0 %v1888_v4 }
  0x18   :  { %1604 = vmatprep.mubr.msk.bf16.mxu0 %vm1836_vm0, %v1835_v8  ;;  %1602 = vmatprep.subr.bf16.mxu0 %v1835_v8 }
  0x19   :  { %1609 = vmatpush3.bf16.msra.mxu1 %v1868_v0  ;;  %1612 = vmatprep.mubr.msk.bf16.mxu1 %vm1836_vm0, %v1835_v8 }
  0x1a   :  { %1610 = vmatprep.subr.bf16.mxu1 %v1835_v8 }
  0x1b   :  { %1603 = vmatpush3.bf16.msra.mxu0 %v1893_v5 }
  0x1c   :  { %1616 = vmatprep.subr.bf16.mxu0 %v1835_v8 }
  0x1d   :  { %1611 = vmatpush3.bf16.msra.mxu1 %v1873_v1 }
  0x1e   :  { %1624 = vmatprep.subr.bf16.mxu1 %v1835_v8  ;;  %1605 = vmatmul.mubr.msk.bf16.vlgmr.msra.gmra.mrb[4].mxu0 %vm184_vm1, %v183_v10 }
  0x1f   :  { %1617 = vmatpush3.bf16.msra.mxu0 %v1878_v2  ;;  %1620 = vmatprep.mubr.msk.bf16.mxu0 %vm1836_vm0, %v1835_v8 }
  0x20   :  { %1618 = vmatprep.subr.bf16.mxu0 %v1835_v8 }
  0x23   :  { %1619 = vmatpush3.bf16.msra.mxu0 %v1883_v3 }
  0x24   :  { %1632 = vmatprep.subr.bf16.mxu0 %v1835_v8 }
  0xe9   :  { %v222_v13 = vpop.f32.mrb[0].mxu0 }
  0xea   :  { %v262_v14 = vpop.f32.mrb[0].mxu1  ;;  %v270_v15 = vadd.f32 %v269_v12, %v222_v13  ;;  %v1590_v16 = vpop.f32.mrb[1].mxu0  ;;  %v435_v12 = vunpack.c.h.bf16 %v1470_v56 }
  0xeb   :  { %v1598_v17 = vpop.f32.mrb[1].mxu1  ;;  %v225_v18 = vpop.f32.mrb[2].mxu0  ;;  %v278_v24 = vadd.f32 %v277_v23, %v262_v14 }
  0xec   :  { %v265_v19 = vpop.f32.mrb[2].mxu1  ;;  %v271_v20 = vmul.f32 0.5, %v270_v15  ;;  %v1591_v21 = vpop.f32.mrb[3].mxu0 }
  0xed   :  { %v1599_v22 = vpop.f32.mrb[3].mxu1  ;;  %v279_v29 = vmul.f32 0.5, %v278_v24 }
  0xee   :  { %1781 = vtanh.f32 %v271_v20 }
  0xef   :  { %1783 = vtanh.f32 %v279_v29 }
  0xf1   :  { %v320_v25 = vpop.f32.mrb[4].mxu0 }
  0xf2   :  { %v1606_v26 = vpop.f32.mrb[5].mxu0  ;;  %v321_v34 = vadd.f32 %v1939_v30, %v320_v25  ;;  %v1475_v25 = vld [vmem:[%s2166_s0 + $0x18] sm:$0xff]  }
  0xf3   :  { %v323_v27 = vpop.f32.mrb[6].mxu0  ;;  %v574_v26 = vunpack.c.l.bf16 %v1475_v25 }
  0xf4   :  { %v1607_v28 = vpop.f32.mrb[7].mxu0 }
  0xf8   :  { %v1782_v31 = vpop.eup %1781 }
  0xf9   :  { %v273_v33 = vadd.f32 1.0, %v1782_v31  ;;  %v1784_v39 = vpop.eup %1783 }
  0xfa   :  { %v281_v40 = vadd.f32 1.0, %v1784_v39 }
  0xfb   :  { %v274_v35 = vmul.f32 0.5, %v273_v33 }
  0xfc   :  { %v282_v41 = vmul.f32 0.5, %v281_v40 }
  0xfd   :  { %v326_v37 = vmul.f32 %v321_v34, %v274_v35 }
  0xff   :  { %v327_v38 = vadd.f32 %v326_v37, %v285_v36 }
 0x101   :  { %1785 = vtanh.f32 %v327_v38  ;;  %v582_v38 = vunpack.c.h.bf16 %v1475_v25 }
 0x10b   :  { %v1786_v42 = vpop.eup %1785 }
 0x10c   :  { %v329_v43 = vsub.f32 %v167_v9, %v1786_v42 }
 0x10e   :  { %v330_v44 = vmul.f32 %v329_v43, %v282_v41 }
 0x110   :  { %v331_v45 = vadd.f32 %v1786_v42, %v330_v44 }
 0x112   :  { %332 = vst.msk [vmem:[%s2170_s4] sm:$0xff] %vm184_vm1, %v331_v45  ;;  %v333_v46 = vpack.c.bf16 %v331_v45, %v331_v45 }
 0x114   :  { %1613 = vmatmul.mubr.msk.bf16.vlgmr.msra.gmra.mrb[4].mxu1 %vm184_vm1, %v333_v46  ;;  %1621 = vmatmul.mubr.msk.bf16.vlgmr.msra.gmra.mrb[8].mxu0 %vm184_vm1, %v333_v46 }
 0x115   :  { %1625 = vmatpush3.bf16.msra.mxu1 %v1888_v4  ;;  %1628 = vmatprep.mubr.msk.bf16.mxu1 %vm1836_vm0, %v1835_v8 }
 0x116   :  { %1626 = vmatprep.subr.bf16.mxu1 %v1835_v8  ;;  %1633 = vmatpush3.bf16.msra.mxu0 %v1868_v0 }
 0x117   :  { %1634 = vmatprep.subr.bf16.mxu0 %v1835_v8  ;;  %1636 = vmatprep.mubr.msk.bf16.mxu0 %vm1836_vm0, %v1835_v8 }
 0x119   :  { %1627 = vmatpush3.bf16.msra.mxu1 %v1893_v5 }
 0x11a   :  { %1640 = vmatprep.subr.bf16.mxu1 %v1835_v8  ;;  %1635 = vmatpush3.bf16.msra.mxu0 %v1873_v1 }
 0x11b   :  { %1648 = vmatprep.subr.bf16.mxu0 %v1835_v8 }
 0x11c   :  { %1629 = vmatmul.mubr.msk.bf16.vlgmr.msra.gmra.mrb[8].mxu1 %vm184_vm1, %v333_v46  ;;  %v1477_v46 = vld [vmem:[%s2166_s0 + $0x20] sm:$0xff]  }
 0x11d   :  { %1641 = vmatpush3.bf16.msra.mxu1 %v1878_v2  ;;  %1644 = vmatprep.mubr.msk.bf16.mxu1 %vm1836_vm0, %v1835_v8 }
 0x11e   :  { %1642 = vmatprep.subr.bf16.mxu1 %v1835_v8 }
 0x121   :  { %1643 = vmatpush3.bf16.msra.mxu1 %v1883_v3 }
 0x122   :  { %1656 = vmatprep.subr.bf16.mxu1 %v1835_v8 }
 0x1e7   :  { %v371_v48 = vpop.f32.mrb[4].mxu1  ;;  %v411_v49 = vpop.f32.mrb[8].mxu0 }
 0x1e8   :  { %v420_v50 = vadd.f32 %v419_v47, %v371_v48  ;;  %v1614_v51 = vpop.f32.mrb[5].mxu1  ;;  %v1622_v52 = vpop.f32.mrb[9].mxu0  ;;  %v428_v62 = vadd.f32 %v427_v59, %v411_v49  ;;  %v590_v49 = vunpack.c.l.bf16 %v1477_v46 }
 0x1e9   :  { %v374_v53 = vpop.f32.mrb[6].mxu1  ;;  %v414_v54 = vpop.f32.mrb[10].mxu0 }
 0x1ea   :  { %v421_v55 = vmul.f32 0.5, %v420_v50  ;;  %v1615_v57 = vpop.f32.mrb[7].mxu1  ;;  %v1623_v58 = vpop.f32.mrb[11].mxu0  ;;  %v429_v7 = vmul.f32 0.5, %v428_v62  ;;  %v729_v62 = vunpack.c.h.bf16 %v1477_v46 }
 0x1ec   :  { %1787 = vtanh.f32 %v421_v55 }
 0x1ed   :  { %1789 = vtanh.f32 %v429_v7 }
 0x1ef   :  { %v470_v60 = vpop.f32.mrb[8].mxu1 }
 0x1f0   :  { %v1630_v61 = vpop.f32.mrb[9].mxu1  ;;  %v471_v13 = vadd.f32 %v1939_v30, %v470_v60 }
 0x1f1   :  { %v473_v63 = vpop.f32.mrb[10].mxu1 }
 0x1f2   :  { %v1631_v6 = vpop.f32.mrb[11].mxu1 }
 0x1f6   :  { %v1788_v9 = vpop.eup %1787 }
 0x1f7   :  { %v423_v10 = vadd.f32 1.0, %v1788_v9  ;;  %v1790_v16 = vpop.eup %1789 }
 0x1f8   :  { %v431_v17 = vadd.f32 1.0, %v1790_v16 }
 0x1f9   :  { %v424_v11 = vmul.f32 0.5, %v423_v10 }
 0x1fa   :  { %v432_v19 = vmul.f32 0.5, %v431_v17 }
 0x1fb   :  { %v476_v14 = vmul.f32 %v471_v13, %v424_v11 }
 0x1fd   :  { %v477_v15 = vadd.f32 %v476_v14, %v435_v12  ;;  %v1482_v14 = vld [vmem:[%s2166_s0 + $0x28] sm:$0xff]  }
 0x1fe   :  { %v737_v17 = vunpack.c.l.bf16 %v1482_v14 }
 0x1ff   :  { %1791 = vtanh.f32 %v477_v15 }
 0x209   :  { %v1792_v18 = vpop.eup %1791 }
 0x20a   :  { %v479_v20 = vsub.f32 %v331_v45, %v1792_v18 }
 0x20c   :  { %v480_v21 = vmul.f32 %v479_v20, %v432_v19 }
 0x20e   :  { %v481_v22 = vadd.f32 %v1792_v18, %v480_v21 }
 0x210   :  { %483 = vrot.lane.b32.xlu0 %v481_v22, %s1837_s10  ;;  %v488_v23 = vpack.c.bf16 %v481_v22, %v481_v22 }
 0x212   :  { %1637 = vmatmul.mubr.msk.bf16.vlgmr.msra.gmra.mrb[12].mxu0 %vm184_vm1, %v488_v23  ;;  %1645 = vmatmul.mubr.msk.bf16.vlgmr.msra.gmra.mrb[12].mxu1 %vm184_vm1, %v488_v23 }
 0x213   :  { %1649 = vmatpush3.bf16.msra.mxu0 %v1888_v4  ;;  %1652 = vmatprep.mubr.msk.bf16.mxu0 %vm1836_vm0, %v1835_v8 }
 0x214   :  { %1650 = vmatprep.subr.bf16.mxu0 %v1835_v8  ;;  %1657 = vmatpush3.bf16.msra.mxu1 %v1868_v0 }
 0x215   :  { %1658 = vmatprep.subr.bf16.mxu1 %v1835_v8  ;;  %1660 = vmatprep.mubr.msk.bf16.mxu1 %vm1836_vm0, %v1835_v8 }
 0x217   :  { %1651 = vmatpush3.bf16.msra.mxu0 %v1893_v5 }
 0x218   :  { %1664 = vmatprep.subr.bf16.mxu0 %v1835_v8  ;;  %1659 = vmatpush3.bf16.msra.mxu1 %v1873_v1 }
 0x219   :  { %1672 = vmatprep.subr.bf16.mxu1 %v1835_v8 }
 0x21a   :  { %1653 = vmatmul.mubr.msk.bf16.vlgmr.msra.gmra.mrb[16].mxu0 %vm184_vm1, %v488_v23 }
 0x21b   :  { %1665 = vmatpush3.bf16.msra.mxu0 %v1878_v2  ;;  %1668 = vmatprep.mubr.msk.bf16.mxu0 %vm1836_vm0, %v1835_v8 }
 0x21c   :  { %1666 = vmatprep.subr.bf16.mxu0 %v1835_v8 }
 0x21f   :  { %1667 = vmatpush3.bf16.msra.mxu0 %v1883_v3 }
 0x220   :  { %1680 = vmatprep.subr.bf16.mxu0 %v1835_v8 }
 0x282   :  { %v484_v24 = vpop.permute.xlu0 %483 }
 0x283   :  { %487 = vst.msk [vmem:[%s2170_s4] sm:$0xff] %vm486_vm2, %v484_v24 }
 0x2e5   :  { %v526_v27 = vpop.f32.mrb[12].mxu0  ;;  %v566_v28 = vpop.f32.mrb[12].mxu1 }
 0x2e6   :  { %v575_v29 = vadd.f32 %v574_v26, %v526_v27  ;;  %v1638_v31 = vpop.f32.mrb[13].mxu0  ;;  %v1646_v32 = vpop.f32.mrb[13].mxu1  ;;  %v583_v41 = vadd.f32 %v582_v38, %v566_v28  ;;  %v745_v27 = vunpack.c.h.bf16 %v1482_v14 }
 0x2e7   :  { %v529_v33 = vpop.f32.mrb[14].mxu0  ;;  %v569_v34 = vpop.f32.mrb[14].mxu1 }
 0x2e8   :  { %v576_v35 = vmul.f32 0.5, %v575_v29  ;;  %v1639_v36 = vpop.f32.mrb[15].mxu0  ;;  %v1647_v37 = vpop.f32.mrb[15].mxu1  ;;  %v584_v44 = vmul.f32 0.5, %v583_v41 }
 0x2ea   :  { %1793 = vtanh.f32 %v576_v35 }
 0x2eb   :  { %1795 = vtanh.f32 %v584_v44 }
 0x2ed   :  { %v625_v39 = vpop.f32.mrb[16].mxu0 }
 0x2ee   :  { %v1654_v40 = vpop.f32.mrb[17].mxu0  ;;  %v626_v50 = vadd.f32 %v1939_v30, %v625_v39 }
 0x2ef   :  { %v628_v42 = vpop.f32.mrb[18].mxu0  ;;  %v1487_v40 = vld [vmem:[%s2166_s0 + $0x30] sm:$0xff]  }
 0x2f0   :  { %v1655_v43 = vpop.f32.mrb[19].mxu0  ;;  %v884_v41 = vunpack.c.l.bf16 %v1487_v40 }
 0x2f4   :  { %v1794_v45 = vpop.eup %1793 }
 0x2f5   :  { %v578_v47 = vadd.f32 1.0, %v1794_v45  ;;  %v1796_v53 = vpop.eup %1795 }
 0x2f6   :  { %v586_v54 = vadd.f32 1.0, %v1796_v53 }
 0x2f7   :  { %v579_v48 = vmul.f32 0.5, %v578_v47 }
 0x2f8   :  { %v587_v56 = vmul.f32 0.5, %v586_v54 }
 0x2f9   :  { %v631_v51 = vmul.f32 %v626_v50, %v579_v48 }
 0x2fb   :  { %v632_v52 = vadd.f32 %v631_v51, %v590_v49 }
 0x2fd   :  { %1797 = vtanh.f32 %v632_v52  ;;  %v892_v52 = vunpack.c.h.bf16 %v1487_v40 }
 0x307   :  { %v1798_v55 = vpop.eup %1797 }
 0x308   :  { %v634_v57 = vsub.f32 %v481_v22, %v1798_v55 }
 0x30a   :  { %v635_v58 = vmul.f32 %v634_v57, %v587_v56 }
 0x30c   :  { %v636_v59 = vadd.f32 %v1798_v55, %v635_v58 }
 0x30e   :  { %638 = vrot.lane.b32.xlu1 %v636_v59, %s1838_s17  ;;  %v643_v60 = vpack.c.bf16 %v636_v59, %v636_v59 }
 0x310   :  { %1661 = vmatmul.mubr.msk.bf16.vlgmr.msra.gmra.mrb[16].mxu1 %vm184_vm1, %v643_v60  ;;  %1669 = vmatmul.mubr.msk.bf16.vlgmr.msra.gmra.mrb[20].mxu0 %vm184_vm1, %v643_v60 }
 0x311   :  { %1673 = vmatpush3.bf16.msra.mxu1 %v1888_v4  ;;  %1676 = vmatprep.mubr.msk.bf16.mxu1 %vm1836_vm0, %v1835_v8 }
 0x312   :  { %1674 = vmatprep.subr.bf16.mxu1 %v1835_v8  ;;  %1681 = vmatpush3.bf16.msra.mxu0 %v1868_v0 }
 0x313   :  { %1682 = vmatprep.subr.bf16.mxu0 %v1835_v8  ;;  %1684 = vmatprep.mubr.msk.bf16.mxu0 %vm1836_vm0, %v1835_v8 }
 0x315   :  { %1675 = vmatpush3.bf16.msra.mxu1 %v1893_v5 }
 0x316   :  { %1688 = vmatprep.subr.bf16.mxu1 %v1835_v8  ;;  %1683 = vmatpush3.bf16.msra.mxu0 %v1873_v1 }
 0x317   :  { %1696 = vmatprep.subr.bf16.mxu0 %v1835_v8 }
 0x318   :  { %1677 = vmatmul.mubr.msk.bf16.vlgmr.msra.gmra.mrb[20].mxu1 %vm184_vm1, %v643_v60  ;;  %v1489_v60 = vld [vmem:[%s2166_s0 + $0x38] sm:$0xff]  }
 0x319   :  { %1689 = vmatpush3.bf16.msra.mxu1 %v1878_v2  ;;  %1692 = vmatprep.mubr.msk.bf16.mxu1 %vm1836_vm0, %v1835_v8 }
 0x31a   :  { %1690 = vmatprep.subr.bf16.mxu1 %v1835_v8 }
 0x31d   :  { %1691 = vmatpush3.bf16.msra.mxu1 %v1883_v3 }
 0x31e   :  { %1704 = vmatprep.subr.bf16.mxu1 %v1835_v8 }
 0x380   :  { %v639_v61 = vpop.permute.xlu1 %638 }
 0x381   :  { %642 = vst.msk [vmem:[%s2170_s4] sm:$0xff] %vm641_vm3, %v639_v61 }
 0x3e3   :  { %v681_v63 = vpop.f32.mrb[16].mxu1  ;;  %v721_v6 = vpop.f32.mrb[20].mxu0 }
 0x3e4   :  { %v730_v7 = vadd.f32 %v729_v62, %v681_v63  ;;  %v1662_v9 = vpop.f32.mrb[17].mxu1  ;;  %v1670_v10 = vpop.f32.mrb[21].mxu0  ;;  %v738_v20 = vadd.f32 %v737_v17, %v721_v6  ;;  %v900_v63 = vunpack.c.l.bf16 %v1489_v60 }
 0x3e5   :  { %v684_v11 = vpop.f32.mrb[18].mxu1  ;;  %v724_v12 = vpop.f32.mrb[22].mxu0 }
 0x3e6   :  { %v731_v13 = vmul.f32 0.5, %v730_v7  ;;  %v1663_v15 = vpop.f32.mrb[19].mxu1  ;;  %v1671_v16 = vpop.f32.mrb[23].mxu0  ;;  %v739_v23 = vmul.f32 0.5, %v738_v20 }
 0x3e8   :  { %1799 = vtanh.f32 %v731_v13 }
 0x3e9   :  { %1801 = vtanh.f32 %v739_v23 }
 0x3eb   :  { %v780_v18 = vpop.f32.mrb[20].mxu1 }
 0x3ec   :  { %v1678_v19 = vpop.f32.mrb[21].mxu1  ;;  %v781_v28 = vadd.f32 %v1939_v30, %v780_v18  ;;  %v1034_v18 = vunpack.c.h.bf16 %v1489_v60 }
 0x3ed   :  { %v783_v21 = vpop.f32.mrb[22].mxu1 }
 0x3ee   :  { %v1679_v22 = vpop.f32.mrb[23].mxu1 }
 0x3f2   :  { %v1800_v24 = vpop.eup %1799 }
 0x3f3   :  { %v733_v25 = vadd.f32 1.0, %v1800_v24  ;;  %v1802_v32 = vpop.eup %1801 }
 0x3f4   :  { %v741_v33 = vadd.f32 1.0, %v1802_v32 }
 0x3f5   :  { %v734_v26 = vmul.f32 0.5, %v733_v25 }
 0x3f6   :  { %v742_v35 = vmul.f32 0.5, %v741_v33 }
 0x3f7   :  { %v786_v29 = vmul.f32 %v781_v28, %v734_v26 }
 0x3f9   :  { %v787_v31 = vadd.f32 %v786_v29, %v745_v27  ;;  %v1494_v27 = vld [vmem:[%s2166_s0 + $0x40] sm:$0xff]  }
 0x3fb   :  { %1803 = vtanh.f32 %v787_v31  ;;  %v1042_v31 = vunpack.c.l.bf16 %v1494_v27 }
 0x405   :  { %v1804_v34 = vpop.eup %1803 }
 0x406   :  { %v789_v36 = vsub.f32 %v636_v59, %v1804_v34 }
 0x408   :  { %v790_v37 = vmul.f32 %v789_v36, %v742_v35 }
 0x40a   :  { %v2037_v38 = vadd.f32 %v1804_v34, %v790_v37 }
 0x40c   :  { %v798_v39 = vpack.c.bf16 %v2037_v38, %v2037_v38 }
 0x40e   :  { %1685 = vmatmul.mubr.msk.bf16.vlgmr.msra.gmra.mrb[24].mxu0 %vm184_vm1, %v798_v39  ;;  %1693 = vmatmul.mubr.msk.bf16.vlgmr.msra.gmra.mrb[24].mxu1 %vm184_vm1, %v798_v39 }
 0x40f   :  { %1697 = vmatpush3.bf16.msra.mxu0 %v1888_v4  ;;  %1700 = vmatprep.mubr.msk.bf16.mxu0 %vm1836_vm0, %v1835_v8 }
 0x410   :  { %1698 = vmatprep.subr.bf16.mxu0 %v1835_v8  ;;  %1705 = vmatpush3.bf16.msra.mxu1 %v1868_v0 }
 0x411   :  { %1706 = vmatprep.subr.bf16.mxu1 %v1835_v8  ;;  %1708 = vmatprep.mubr.msk.bf16.mxu1 %vm1836_vm0, %v1835_v8 }
 0x413   :  { %1699 = vmatpush3.bf16.msra.mxu0 %v1893_v5 }
 0x414   :  { %1712 = vmatprep.subr.bf16.mxu0 %v1835_v8  ;;  %1707 = vmatpush3.bf16.msra.mxu1 %v1873_v1 }
 0x415   :  { %1720 = vmatprep.subr.bf16.mxu1 %v1835_v8 }
 0x416   :  { %1701 = vmatmul.mubr.msk.bf16.vlgmr.msra.gmra.mrb[28].mxu0 %vm184_vm1, %v798_v39 }
 0x417   :  { %1713 = vmatpush3.bf16.msra.mxu0 %v1878_v2  ;;  %1716 = vmatprep.mubr.msk.bf16.mxu0 %vm1836_vm0, %v1835_v8 }
 0x418   :  { %1714 = vmatprep.subr.bf16.mxu0 %v1835_v8 }
 0x41b   :  { %1715 = vmatpush3.bf16.msra.mxu0 %v1883_v3 }
 0x41c   :  { %1728 = vmatprep.subr.bf16.mxu0 %v1835_v8 }
 0x4e1   :  { %v836_v42 = vpop.f32.mrb[24].mxu0  ;;  %v876_v43 = vpop.f32.mrb[24].mxu1 }
 0x4e2   :  { %v885_v44 = vadd.f32 %v884_v41, %v836_v42  ;;  %v1686_v45 = vpop.f32.mrb[25].mxu0  ;;  %v1694_v46 = vpop.f32.mrb[25].mxu1  ;;  %v893_v55 = vadd.f32 %v892_v52, %v876_v43  ;;  %v1050_v42 = vunpack.c.h.bf16 %v1494_v27 }
 0x4e3   :  { %v839_v47 = vpop.f32.mrb[26].mxu0  ;;  %v879_v48 = vpop.f32.mrb[26].mxu1 }
 0x4e4   :  { %v886_v49 = vmul.f32 0.5, %v885_v44  ;;  %v1687_v50 = vpop.f32.mrb[27].mxu0  ;;  %v1695_v51 = vpop.f32.mrb[27].mxu1  ;;  %v894_v58 = vmul.f32 0.5, %v893_v55 }
 0x4e6   :  { %1805 = vtanh.f32 %v886_v49 }
 0x4e7   :  { %1807 = vtanh.f32 %v894_v58 }
 0x4e9   :  { %v935_v53 = vpop.f32.mrb[28].mxu0 }
 0x4ea   :  { %v1702_v54 = vpop.f32.mrb[29].mxu0  ;;  %v936_v6 = vadd.f32 %v1939_v30, %v935_v53 }
 0x4eb   :  { %v938_v56 = vpop.f32.mrb[30].mxu0 }
 0x4ec   :  { %v1703_v57 = vpop.f32.mrb[31].mxu0 }
 0x4f0   :  { %v1806_v59 = vpop.eup %1805 }
 0x4f1   :  { %v888_v61 = vadd.f32 1.0, %v1806_v59  ;;  %v1808_v10 = vpop.eup %1807 }
 0x4f2   :  { %v896_v11 = vadd.f32 1.0, %v1808_v10 }
 0x4f3   :  { %v889_v62 = vmul.f32 0.5, %v888_v61 }
 0x4f4   :  { %v897_v13 = vmul.f32 0.5, %v896_v11 }
 0x4f5   :  { %v941_v7 = vmul.f32 %v936_v6, %v889_v62 }
 0x4f7   :  { %v942_v9 = vadd.f32 %v941_v7, %v900_v63 }
 0x4f9   :  { %1809 = vtanh.f32 %v942_v9 }
 0x503   :  { %v1810_v12 = vpop.eup %1809 }
 0x504   :  { %v944_v14 = vsub.f32 %v2037_v38, %v1810_v12 }
 0x506   :  { %v945_v15 = vmul.f32 %v944_v14, %v897_v13  ;;  %v1501_v14 = vld [vmem:[%s2166_s0 + $0x50] sm:$0xff]  }
 0x508   :  { %v946_v16 = vadd.f32 %v1810_v12, %v945_v15 }
 0x50a   :  { %947 = vst.msk [vmem:[%s2170_s4 + $0x8] sm:$0xff] %vm184_vm1, %v946_v16  ;;  %v948_v17 = vpack.c.bf16 %v946_v16, %v946_v16 }
 0x50c   :  { %1709 = vmatmul.mubr.msk.bf16.vlgmr.msra.gmra.mrb[28].mxu1 %vm184_vm1, %v948_v17  ;;  %1717 = vmatmul.mubr.msk.bf16.vlgmr.msra.gmra.mrb[32].mxu0 %vm184_vm1, %v948_v17 }
 0x50d   :  { %1721 = vmatpush3.bf16.msra.mxu1 %v1888_v4  ;;  %1724 = vmatprep.mubr.msk.bf16.mxu1 %vm1836_vm0, %v1835_v8 }
 0x50e   :  { %1722 = vmatprep.subr.bf16.mxu1 %v1835_v8  ;;  %1729 = vmatpush3.bf16.msra.mxu0 %v1868_v0 }
 0x50f   :  { %1730 = vmatprep.subr.bf16.mxu0 %v1835_v8  ;;  %1732 = vmatprep.mubr.msk.bf16.mxu0 %vm1836_vm0, %v1835_v8 }
 0x511   :  { %1723 = vmatpush3.bf16.msra.mxu1 %v1893_v5 }
 0x512   :  { %1736 = vmatprep.subr.bf16.mxu1 %v1835_v8  ;;  %1731 = vmatpush3.bf16.msra.mxu0 %v1873_v1 }
 0x513   :  { %1744 = vmatprep.subr.bf16.mxu0 %v1835_v8 }
 0x514   :  { %1725 = vmatmul.mubr.msk.bf16.vlgmr.msra.gmra.mrb[32].mxu1 %vm184_vm1, %v948_v17  ;;  %v1204_v17 = vunpack.c.l.bf16 %v1501_v14 }
 0x515   :  { %1737 = vmatpush3.bf16.msra.mxu1 %v1878_v2  ;;  %1740 = vmatprep.mubr.msk.bf16.mxu1 %vm1836_vm0, %v1835_v8 }
 0x516   :  { %1738 = vmatprep.subr.bf16.mxu1 %v1835_v8 }
 0x519   :  { %1739 = vmatpush3.bf16.msra.mxu1 %v1883_v3 }
 0x51a   :  { %1752 = vmatprep.subr.bf16.mxu1 %v1835_v8 }
 0x5df   :  { %v986_v19 = vpop.f32.mrb[28].mxu1  ;;  %v1026_v20 = vpop.f32.mrb[32].mxu0 }
 0x5e0   :  { %v1035_v21 = vadd.f32 %v1034_v18, %v986_v19  ;;  %v1710_v22 = vpop.f32.mrb[29].mxu1  ;;  %v1718_v23 = vpop.f32.mrb[33].mxu0  ;;  %v1043_v34 = vadd.f32 %v1042_v31, %v1026_v20  ;;  %v1342_v31 = vunpack.c.h.bf16 %v1501_v14 }
 0x5e1   :  { %v989_v24 = vpop.f32.mrb[30].mxu1  ;;  %v1029_v25 = vpop.f32.mrb[34].mxu0 }
 0x5e2   :  { %v1036_v26 = vmul.f32 0.5, %v1035_v21  ;;  %v1711_v28 = vpop.f32.mrb[31].mxu1  ;;  %v1719_v29 = vpop.f32.mrb[35].mxu0  ;;  %v1044_v37 = vmul.f32 0.5, %v1043_v34 }
 0x5e4   :  { %1811 = vtanh.f32 %v1036_v26 }
 0x5e5   :  { %1813 = vtanh.f32 %v1044_v37 }
 0x5e7   :  { %v1085_v32 = vpop.f32.mrb[32].mxu1 }
 0x5e8   :  { %v1726_v33 = vpop.f32.mrb[33].mxu1  ;;  %v1086_v43 = vadd.f32 %v1939_v30, %v1085_v32 }
 0x5e9   :  { %v1088_v35 = vpop.f32.mrb[34].mxu1 }
 0x5ea   :  { %v1727_v36 = vpop.f32.mrb[35].mxu1 }
 0x5ee   :  { %v1812_v39 = vpop.eup %1811 }
 0x5ef   :  { %v1038_v40 = vadd.f32 1.0, %v1812_v39  ;;  %v1814_v46 = vpop.eup %1813 }
 0x5f0   :  { %v1046_v47 = vadd.f32 1.0, %v1814_v46 }
 0x5f1   :  { %v1039_v41 = vmul.f32 0.5, %v1038_v40 }
 0x5f2   :  { %v1047_v49 = vmul.f32 0.5, %v1046_v47 }
 0x5f3   :  { %v1091_v44 = vmul.f32 %v1086_v43, %v1039_v41 }
 0x5f5   :  { %v1092_v45 = vadd.f32 %v1091_v44, %v1050_v42 }
 0x5f7   :  { %1815 = vtanh.f32 %v1092_v45 }
 0x601   :  { %v1816_v48 = vpop.eup %1815 }
 0x602   :  { %v1094_v50 = vsub.f32 %v946_v16, %v1816_v48 }
 0x604   :  { %v1095_v51 = vmul.f32 %v1094_v50, %v1047_v49 }
 0x606   :  { %v2099_v52 = vadd.f32 %v1816_v48, %v1095_v51 }
 0x608   :  { %1098 = vrot.lane.b32.xlu0 %v2099_v52, %s1837_s10  ;;  %v1102_v53 = vpack.c.bf16 %v2099_v52, %v2099_v52 }
 0x60a   :  { %1733 = vmatmul.mubr.msk.bf16.vlgmr.msra.gmra.mrb[36].mxu0 %vm184_vm1, %v1102_v53  ;;  %1741 = vmatmul.mubr.msk.bf16.vlgmr.msra.gmra.mrb[36].mxu1 %vm184_vm1, %v1102_v53 }
 0x60b   :  { %1745 = vmatpush3.bf16.msra.mxu0 %v1888_v4  ;;  %1748 = vmatprep.mubr.msk.bf16.mxu0 %vm1836_vm0, %v1835_v8 }
 0x60c   :  { %793 = vrot.lane.b32.xlu0 %v2037_v38, %s1839_s30  ;;  %1746 = vmatprep.subr.bf16.mxu0 %v1835_v8 }
 0x60d   :  { %1753 = vmatpush3.bf16.msra.mxu1 %v1868_v0  ;;  %1756 = vmatprep.mubr.msk.bf16.mxu1 %vm1836_vm0, %v1835_v8 }
 0x60e   :  { %1754 = vmatprep.subr.bf16.mxu1 %v1835_v8 }
 0x60f   :  { %1747 = vmatpush3.bf16.msra.mxu0 %v1893_v5 }
 0x610   :  { %1760 = vmatprep.subr.bf16.mxu0 %v1835_v8 }
 0x611   :  { %1755 = vmatpush3.bf16.msra.mxu1 %v1873_v1 }
 0x612   :  { %1749 = vmatmul.mubr.msk.bf16.vlgmr.msra.gmra.mrb[40].mxu0 %vm184_vm1, %v1102_v53  ;;  %1768 = vmatprep.subr.bf16.mxu1 %v1835_v8 }
 0x613   :  { %1761 = vmatpush3.bf16.msra.mxu0 %v1878_v2  ;;  %1764 = vmatprep.mubr.msk.bf16.mxu0 %vm1836_vm0, %v1835_v8  ;;  %v1499_v2 = vld [vmem:[%s2166_s0 + $0x48] sm:$0xff]  }
 0x614   :  { %1762 = vmatprep.subr.bf16.mxu0 %v1835_v8  ;;  %v1188_v38 = vunpack.c.l.bf16 %v1499_v2  ;;  %v1196_v63 = vunpack.c.h.bf16 %v1499_v2 }
 0x617   :  { %1763 = vmatpush3.bf16.msra.mxu0 %v1883_v3 }
 0x67a   :  { %v1099_v0 = vpop.permute.xlu0 %1098 }
 0x67b   :  { %1101 = vst.msk [vmem:[%s2170_s4 + $0x8] sm:$0xff] %vm486_vm2, %v1099_v0 }
 0x67e   :  { %v794_v1 = vpop.permute.xlu0 %793 }
 0x67f   :  { %797 = vst.msk [vmem:[%s2170_s4] sm:$0xff] %vm796_vm4, %v794_v1 }
 0x6dd   :  { %v1140_v54 = vpop.f32.mrb[36].mxu0  ;;  %v1180_v3 = vpop.f32.mrb[36].mxu1 }
 0x6de   :  { %v1189_v55 = vadd.f32 %v1188_v38, %v1140_v54  ;;  %v1734_v56 = vpop.f32.mrb[37].mxu0  ;;  %v1742_v57 = vpop.f32.mrb[37].mxu1  ;;  %v1197_v9 = vadd.f32 %v1196_v63, %v1180_v3 }
 0x6df   :  { %v1143_v58 = vpop.f32.mrb[38].mxu0  ;;  %v1183_v59 = vpop.f32.mrb[38].mxu1 }
 0x6e0   :  { %v1190_v60 = vmul.f32 0.5, %v1189_v55  ;;  %v1735_v61 = vpop.f32.mrb[39].mxu0  ;;  %v1743_v62 = vpop.f32.mrb[39].mxu1  ;;  %v1198_v12 = vmul.f32 0.5, %v1197_v9 }
 0x6e2   :  { %1817 = vtanh.f32 %v1190_v60 }
 0x6e3   :  { %1819 = vtanh.f32 %v1198_v12 }
 0x6e5   :  { %v1239_v6 = vpop.f32.mrb[40].mxu0 }
 0x6e6   :  { %v1750_v7 = vpop.f32.mrb[41].mxu0  ;;  %v1240_v18 = vadd.f32 %v1939_v30, %v1239_v6 }
 0x6e7   :  { %v1242_v10 = vpop.f32.mrb[42].mxu0 }
 0x6e8   :  { %v1751_v11 = vpop.f32.mrb[43].mxu0 }
 0x6ec   :  { %v1818_v13 = vpop.eup %1817 }
 0x6ed   :  { %v1192_v15 = vadd.f32 1.0, %v1818_v13  ;;  %v1820_v21 = vpop.eup %1819 }
 0x6ee   :  { %v1200_v22 = vadd.f32 1.0, %v1820_v21 }
 0x6ef   :  { %v1193_v16 = vmul.f32 0.5, %v1192_v15 }
 0x6f0   :  { %v1201_v24 = vmul.f32 0.5, %v1200_v22 }
 0x6f1   :  { %v1245_v19 = vmul.f32 %v1240_v18, %v1193_v16 }
 0x6f3   :  { %v1246_v20 = vadd.f32 %v1245_v19, %v1204_v17 }
 0x6f5   :  { %1821 = vtanh.f32 %v1246_v20 }
 0x6ff   :  { %v1822_v23 = vpop.eup %1821 }
 0x700   :  { %v1248_v25 = vsub.f32 %v2099_v52, %v1822_v23 }
 0x702   :  { %v1249_v26 = vmul.f32 %v1248_v25, %v1201_v24 }
 0x704   :  { %v1250_v27 = vadd.f32 %v1822_v23, %v1249_v26 }
 0x706   :  { %1252 = vrot.lane.b32.xlu1 %v1250_v27, %s1838_s17  ;;  %v1256_v28 = vpack.c.bf16 %v1250_v27, %v1250_v27 }
 0x708   :  { %1757 = vmatmul.mubr.msk.bf16.vlgmr.msra.gmra.mrb[40].mxu1 %vm184_vm1, %v1256_v28  ;;  %1765 = vmatmul.mubr.msk.bf16.vlgmr.msra.gmra.mrb[44].mxu0 %vm184_vm1, %v1256_v28 }
 0x709   :  { %1769 = vmatpush3.bf16.msra.mxu1 %v1888_v4  ;;  %1772 = vmatprep.mubr.msk.bf16.mxu1 %vm1836_vm0, %v1835_v8 }
 0x70a   :  { %1770 = vmatprep.subr.bf16.mxu1 %v1835_v8 }
 0x70d   :  { %1771 = vmatpush3.bf16.msra.mxu1 %v1893_v5  ;;  %v1506_v5 = vld [vmem:[%s2166_s0 + $0x58] sm:$0xff]  }
 0x70e   :  { %v1350_v41 = vunpack.c.l.bf16 %v1506_v5  ;;  %v1358_v51 = vunpack.c.h.bf16 %v1506_v5 }
 0x710   :  { %1773 = vmatmul.mubr.msk.bf16.vlgmr.msra.gmra.mrb[44].mxu1 %vm184_vm1, %v1256_v28 }
 0x778   :  { %v1253_v29 = vpop.permute.xlu1 %1252 }
 0x779   :  { %1255 = vst.msk [vmem:[%s2170_s4 + $0x8] sm:$0xff] %vm641_vm3, %v1253_v29 }
 0x7db   :  { %v1294_v32 = vpop.f32.mrb[40].mxu1  ;;  %v1334_v33 = vpop.f32.mrb[44].mxu0 }
 0x7dc   :  { %v1343_v34 = vadd.f32 %v1342_v31, %v1294_v32  ;;  %v1758_v4 = vpop.f32.mrb[41].mxu1  ;;  %v1766_v35 = vpop.f32.mrb[45].mxu0  ;;  %v1351_v44 = vadd.f32 %v1350_v41, %v1334_v33 }
 0x7dd   :  { %v1297_v36 = vpop.f32.mrb[42].mxu1  ;;  %v1337_v37 = vpop.f32.mrb[46].mxu0 }
 0x7de   :  { %v1344_v39 = vmul.f32 0.5, %v1343_v34  ;;  %v1759_v8 = vpop.f32.mrb[43].mxu1  ;;  %v1767_v40 = vpop.f32.mrb[47].mxu0  ;;  %v1352_v47 = vmul.f32 0.5, %v1351_v44 }
 0x7e0   :  { %1823 = vtanh.f32 %v1344_v39 }
 0x7e1   :  { %1825 = vtanh.f32 %v1352_v47 }
 0x7e3   :  { %v1393_v42 = vpop.f32.mrb[44].mxu1 }
 0x7e4   :  { %v1774_v43 = vpop.f32.mrb[45].mxu1  ;;  %v1394_v52 = vadd.f32 %v1939_v30, %v1393_v42 }
 0x7e5   :  { %v1396_v45 = vpop.f32.mrb[46].mxu1 }
 0x7e6   :  { %v1775_v46 = vpop.f32.mrb[47].mxu1 }
 0x7ea   :  { %v1824_v48 = vpop.eup %1823 }
 0x7eb   :  { %v1346_v49 = vadd.f32 1.0, %v1824_v48  ;;  %v1826_v1 = vpop.eup %1825 }
 0x7ec   :  { %v1354_v2 = vadd.f32 1.0, %v1826_v1 }
 0x7ed   :  { %v1347_v50 = vmul.f32 0.5, %v1346_v49 }
 0x7ee   :  { %v1355_v54 = vmul.f32 0.5, %v1354_v2 }
 0x7ef   :  { %v1399_v53 = vmul.f32 %v1394_v52, %v1347_v50 }
 0x7f1   :  { %v1400_v0 = vadd.f32 %v1399_v53, %v1358_v51 }
 0x7f3   :  { %1827 = vtanh.f32 %v1400_v0 }
 0x7fd   :  { %v1828_v38 = vpop.eup %1827 }
 0x7fe   :  { %v1402_v3 = vsub.f32 %v1250_v27, %v1828_v38 }
 0x800   :  { %v1403_v55 = vmul.f32 %v1402_v3, %v1355_v54 }
 0x802   :  { %v1404_v56 = vadd.f32 %v1828_v38, %v1403_v55 }
 0x804   :  { %1406 = vrot.lane.b32.xlu1 %v1404_v56, %s1839_s30  ;;  %1410 = vst.msk [vmem:[#allocation2] sm:$0xff] %vm184_vm1, %v1404_v56 }
 0x876   :  { %v1407_v57 = vpop.permute.xlu1 %1406 }
 0x877   :  { %1409 = vst.msk [vmem:[%s2170_s4 + $0x8] sm:$0xff] %vm796_vm4, %v1407_v57 }
 0x878   :  { %1415 = vsyncmov [#allocation5] }
 0x87b   :  { %s1416_s15 = vpop.sfrf %1415 }
 0x87c   :  { %p1509_p0 = scmp.ne.s32.totalorder %s1416_s15, 0 }
 0x87e   :  { %1420 = shalt.err (%p1509_p0)  }
 0x87f   :  { %1422 = vsyncmov [#allocation5 + $0x1] }
 0x882   :  { %s1423_s16 = vpop.sfrf %1422 }
 0x883   :  { %p1510_p1 = scmp.ne.s32.totalorder %s1423_s16, 0 }
 0x885   :  { %1427 = shalt.err (%p1510_p1)  }
 0x886   :  { %1429 = vsyncmov [#allocation5 + $0x2] }
 0x889   :  { %s1430_s17 = vpop.sfrf %1429 }
 0x88a   :  { %p1511_p2 = scmp.ne.s32.totalorder %s1430_s17, 0 }
 0x88c   :  { %1434 = shalt.err (%p1511_p2)  }

</bundles_post_ra>
